<compile_context>
chip_gen: v7x
topology: tpu7x:2x2x1
jax: 0.10.0
libtpu: 0.0.40
codegen_flags: <defaults>
</compile_context>

<pallas_src>
import jax
import jax.numpy as jnp
from jax import lax
from jax.experimental import pallas as pl
from jax.experimental.pallas import tpu as pltpu

LANE = 128


def _round_up(x, m):
    return ((x + m - 1) // m) * m


def _vmem_limit_bytes():
    # 64 MiB on v5e/v6e (128 MiB physical), 32 MiB on v7x (64 MiB physical).
    try:
        cap = getattr(pltpu.get_tpu_info(), "vmem_capacity_bytes",
                      128 * 1024 * 1024)
    except Exception:
        cap = 128 * 1024 * 1024
    return int(min(cap // 2, 64 * 1024 * 1024))


VMEM_LIMIT = _vmem_limit_bytes()


# ----------------------- Pallas kernels -----------------------

def _conv_mm_kernel(a_ref, w_ref, b_ref, o_ref):
    # (tm, K) bf16 @ (K, 128) bf16 -> f32 acc, + bias, LeakyReLU(0.2),
    # single unmasked (tm, 128) store (lane-dense output).
    acc = jnp.dot(a_ref[...], w_ref[...], preferred_element_type=jnp.float32)
    acc = acc + b_ref[...]
    o_ref[...] = jnp.where(acc >= 0.0, acc, 0.2 * acc)


def conv_matmul_bias_lrelu(a, w_pad, bias_pad, *, tm):
    """a: (2, Mp, K) bf16, w_pad: (K, 128) bf16, bias_pad: (1, 128) f32."""
    nb, mp, k = a.shape
    assert mp % tm == 0 and tm % 8 == 0
    return pl.pallas_call(
        _conv_mm_kernel,
        out_shape=jax.ShapeDtypeStruct((nb, mp, LANE), jnp.float32),
        grid=(nb, mp // tm),
        in_specs=[
            pl.BlockSpec((None, tm, k), lambda b, i: (b, i, 0)),   # streamed A
            pl.BlockSpec((k, LANE), lambda b, i: (0, 0)),          # resident W
            pl.BlockSpec((1, LANE), lambda b, i: (0, 0)),          # resident bias
        ],
        out_specs=pl.BlockSpec((None, tm, LANE), lambda b, i: (b, i, 0)),
        compiler_params=pltpu.CompilerParams(
            dimension_semantics=("parallel", "parallel"),
            vmem_limit_bytes=VMEM_LIMIT),
    )(a, w_pad, bias_pad)


def _sse_kernel(x_ref, m_ref, o_ref):
    # x_ref: (2, tr, 128) f32 -- branch 0 = real rows, branch 1 = fake rows.
    # m_ref: (tr, 1) f32 pre-scaled mask column (broadcast across lanes).
    @pl.when(pl.program_id(1) == 0)
    def _():
        o_ref[...] = jnp.zeros_like(o_ref)

    d = x_ref[0] - x_ref[1]              # (tr, 128), pure VPU
    o_ref[...] += d * d * m_ref[...]     # lane broadcast of the mask column


def masked_sse_partials(slab, mask_col, *, tr):
    """slab: (2, Mp, 128) f32, mask_col: (Mp, 1) f32 -> partial sums."""
    _, mp, _ = slab.shape
    assert mp % tr == 0
    num_tiles = mp // tr
    # 2-way split of the reduction (v7x megacore) when it divides evenly.
    n_split = 2 if (num_tiles >= 2 and num_tiles % 2 == 0) else 1
    tiles_per = num_tiles // n_split
    return pl.pallas_call(
        _sse_kernel,
        out_shape=jax.ShapeDtypeStruct((n_split, tr, LANE), jnp.float32),
        grid=(n_split, tiles_per),
        in_specs=[
            pl.BlockSpec((2, tr, LANE), lambda c, i: (0, c * tiles_per + i, 0)),
            pl.BlockSpec((tr, 1), lambda c, i: (c * tiles_per + i, 0)),
        ],
        out_specs=pl.BlockSpec((None, tr, LANE), lambda c, i: (c, 0, 0)),
        compiler_params=pltpu.CompilerParams(
            dimension_semantics=("parallel", "arbitrary"),
            vmem_limit_bytes=VMEM_LIMIT),
    )(slab, mask_col)


# ----------------------- glue (plain JAX) -----------------------

def bilinear_matrix(out_size, in_size):
    """Row-interpolation matrix matching F.interpolate(mode='bilinear',
    align_corners=False) along one axis (downsampling): out = A @ in."""
    scale = in_size / out_size
    i = jnp.arange(out_size, dtype=jnp.float32)
    src = jnp.maximum((i + 0.5) * scale - 0.5, 0.0)
    i0f = jnp.floor(src)
    lam = src - i0f
    i0 = jnp.clip(i0f.astype(jnp.int32), 0, in_size - 1)
    i1 = jnp.clip(i0 + 1, 0, in_size - 1)
    rows = jnp.arange(out_size)
    a = jnp.zeros((out_size, in_size), dtype=jnp.float32)
    a = a.at[rows, i0].add(1.0 - lam)
    a = a.at[rows, i1].add(lam)
    return a


def conv_layer_slab(h, w, b, *, n_branch):
    """3x3 stride-2 conv + LeakyReLU(0.2) on NHWC input of batch 2*n_branch.
    Returns the lane-padded (2, Mp, 128) f32 output slab plus layer meta."""
    bsz, hh, ww, cin = h.shape
    cout = w.shape[0]
    ho = (hh + 2 - 3) // 2 + 1
    wo = (ww + 2 - 3) // 2 + 1
    k = 9 * cin

    # im2col patches in bf16 (halves the streamed-A HBM traffic).
    # TODO(synk): fold this gather into the kernel at production resolutions.
    hb = jnp.pad(h.astype(jnp.bfloat16), ((0, 0), (1, 1), (1, 1), (0, 0)))
    taps = [hb[:, dh::2, dw::2, :][:, :ho, :wo, :]
            for dh in range(3) for dw in range(3)]
    patches = jnp.concatenate(taps, axis=-1)          # (B, Ho, Wo, K), (dh,dw,ci)

    m_half = n_branch * ho * wo                       # rows per branch
    tm = min(1024, _round_up(m_half, 8))
    mp = _round_up(m_half, tm)
    a = patches.reshape(2, m_half, k)
    if mp != m_half:
        a = jnp.pad(a, ((0, 0), (0, mp - m_half), (0, 0)))

    wmat = jnp.transpose(w, (2, 3, 1, 0)).reshape(k, cout)      # (dh,dw,ci) x co
    w_pad = jnp.zeros((k, LANE), jnp.float32).at[:, :cout].set(wmat)
    w_pad = w_pad.astype(jnp.bfloat16)
    b_pad = jnp.zeros((1, LANE), jnp.float32).at[:, :cout].set(b[None, :])

    slab = conv_matmul_bias_lrelu(a, w_pad, b_pad, tm=tm)       # (2, Mp, 128)
    return slab, (ho, wo, cout, m_half, tm)


def feature_matching_loss(fake, real, mask, params):
    n = real.shape[0]
    x = jnp.concatenate([real, fake], axis=0)          # one discriminator pass
    h = jnp.transpose(x, (0, 2, 3, 1))                 # NCHW -> NHWC (once)
    hin, win = mask.shape[-2:]
    m2 = mask[:, 0]                                    # (N, Hin, Win)

    total = jnp.float32(0.0)
    for w, b in params:
        slab, (ho, wo, cout, m_half, tm) = conv_layer_slab(h, w, b, n_branch=n)
        # next-layer input: valid rows / channels only
        h = slab[:, :m_half, :cout].reshape(2 * n, ho, wo, cout)

        # bilinear(align_corners=False) mask resize via tiny interp matrices,
        # mean normalisation folded in, zero on padded rows.
        ah = bilinear_matrix(ho, hin)
        aw = bilinear_matrix(wo, win)
        interp = jnp.einsum('ph,nhw,qw->npq', ah, m2, aw)       # (N, Ho, Wo)
        mcol = interp.reshape(m_half, 1) / (n * cout * ho * wo)
        mp = slab.shape[1]
        if mp != m_half:
            mcol = jnp.pad(mcol, ((0, mp - m_half), (0, 0)))

        total = total + jnp.sum(masked_sse_partials(slab, mcol, tr=tm))
    return total / len(params)


# ----------------------- pure-JAX reference -----------------------

def reference_loss(fake, real, mask, params):
    def features(x):
        hh = jnp.transpose(x, (0, 2, 3, 1))
        feats = []
        for w, b in params:
            wk = jnp.transpose(w, (2, 3, 1, 0))                 # HWIO
            y = lax.conv_general_dilated(
                hh, wk, window_strides=(2, 2), padding=((1, 1), (1, 1)),
                dimension_numbers=('NHWC', 'HWIO', 'NHWC')) + b
            hh = jnp.where(y >= 0.0, y, 0.2 * y)
            feats.append(hh)
        return feats

    hin, win = mask.shape[-2:]
    m2 = mask[:, 0]
    total = jnp.float32(0.0)
    for rf, ff in zip(features(real), features(fake)):
        _, ho, wo, _ = rf.shape
        ah = bilinear_matrix(ho, hin)
        aw = bilinear_matrix(wo, win)
        interp = jnp.einsum('ph,nhw,qw->npq', ah, m2, aw)
        total = total + jnp.mean((rf - ff) ** 2 * interp[..., None])
    return total / len(params)


# ----------------------- main -----------------------

def init_params(key):
    # 3 synthetic discriminator conv layers: 3->8, 8->16, 16->32, 3x3 stride 2.
    dims = [(8, 3), (16, 8), (32, 16)]
    params = []
    for idx, (cout, cin) in enumerate(dims):
        kw, kb = jax.random.split(jax.random.fold_in(key, idx))
        w = 0.1 * jax.random.normal(kw, (cout, cin, 3, 3), jnp.float32)
        b = 0.01 * jax.random.normal(kb, (cout,), jnp.float32)
        params.append((w, b))
    return params


if __name__ == "__main__":
    key = jax.random.PRNGKey(0)
    k_fake, k_real, k_mask, k_param = jax.random.split(key, 4)

    N, C, H, W = 2, 3, 16, 16
    fake = jax.random.normal(k_fake, (N, C, H, W), jnp.float32)
    real = jax.random.normal(k_real, (N, C, H, W), jnp.float32)
    mask = jax.random.uniform(k_mask, (N, 1, H, W), jnp.float32)
    params = init_params(k_param)

    loss = jax.jit(feature_matching_loss)(fake, real, mask, params)
    jax.block_until_ready(loss)
    ref = jax.jit(reference_loss)(fake, real, mask, params)
    jax.block_until_ready(ref)

    assert loss.shape == () and bool(jnp.isfinite(loss))
    # bf16-streamed matmuls with f32 accumulation -> loose tolerance vs f32 ref.
    assert abs(float(loss) - float(ref)) <= 5e-2 * abs(float(ref)) + 1e-3, (
        float(loss), float(ref))
    print("KERNEL_OK")
</pallas_src>

<mosaic_0001>
module attributes {stable_mosaic.version = 11 : i64} {
  func.func @_conv_mm_kernel(%arg0: i32, %arg1: i32, %arg2: memref<1x128x27xbf16, #tpu.memory_space<vmem>>, %arg3: memref<27x128xbf16, #tpu.memory_space<vmem>>, %arg4: memref<1x128xf32, #tpu.memory_space<vmem>>, %arg5: memref<1x128x128xf32, #tpu.memory_space<vmem>>) attributes {dimension_semantics = [#tpu.dimension_semantics<parallel>, #tpu.dimension_semantics<parallel>], iteration_bounds = array<i64: 2, 1>, scalar_prefetch = 0 : i64, scratch_operands = 0 : i64, tpu.core_type = #tpu.core_type<tc>, window_params = [{transform_indices = @transform_0, window_bounds = array<i64: 1, 128, 27>}, {pipeline_mode = #tpu.pipeline_mode<synchronous>, transform_indices = @transform_1, window_bounds = array<i64: 27, 128>}, {pipeline_mode = #tpu.pipeline_mode<synchronous>, transform_indices = @transform_2, window_bounds = array<i64: 1, 128>}, {transform_indices = @transform_3, window_bounds = array<i64: 1, 128, 128>}]} {
    %c0 = arith.constant 0 : index
    %c0_0 = arith.constant 0 : index
    %c0_1 = arith.constant 0 : index
    %0 = vector.load %arg2[%c0, %c0_0, %c0_1] : memref<1x128x27xbf16, #tpu.memory_space<vmem>>, vector<1x128x27xbf16>
    %1 = vector.shape_cast %0 : vector<1x128x27xbf16> to vector<128x27xbf16>
    %c0_2 = arith.constant 0 : index
    %c0_3 = arith.constant 0 : index
    %2 = vector.load %arg3[%c0_2, %c0_3] : memref<27x128xbf16, #tpu.memory_space<vmem>>, vector<27x128xbf16>
    %cst = arith.constant dense<0.000000e+00> : vector<128x128xf32>
    %3 = tpu.matmul %1, %2, %cst {dimension_numbers = #tpu.dot_dimension_numbers<[1], [0], [0], [1], [0, 0, 1, 1], [], []>} : vector<128x27xbf16>, vector<27x128xbf16>, vector<128x128xf32> -> vector<128x128xf32>
    %c0_4 = arith.constant 0 : index
    %c0_5 = arith.constant 0 : index
    %4 = vector.load %arg4[%c0_4, %c0_5] : memref<1x128xf32, #tpu.memory_space<vmem>>, vector<1x128xf32>
    %5 = vector.broadcast %4 : vector<1x128xf32> to vector<128x128xf32>
    %6 = arith.addf %3, %5 : vector<128x128xf32>
    %cst_6 = arith.constant 0.000000e+00 : f32
    %7 = vector.broadcast %cst_6 : f32 to vector<128x128xf32>
    %8 = arith.cmpf oge, %6, %7 : vector<128x128xf32>
    %cst_7 = arith.constant 2.000000e-01 : f32
    %9 = vector.broadcast %cst_7 : f32 to vector<128x128xf32>
    %10 = arith.mulf %9, %6 : vector<128x128xf32>
    %11 = arith.select %8, %6, %10 : vector<128x128xi1>, vector<128x128xf32>
    %c0_8 = arith.constant 0 : index
    %c0_9 = arith.constant 0 : index
    %c0_10 = arith.constant 0 : index
    %12 = vector.load %arg5[%c0_8, %c0_9, %c0_10] : memref<1x128x128xf32, #tpu.memory_space<vmem>>, vector<1x128x128xf32>
    %13 = vector.shape_cast %12 : vector<1x128x128xf32> to vector<128x128xf32>
    %14 = vector.shape_cast %11 : vector<128x128xf32> to vector<1x128x128xf32>
    tpu.vector_store %arg5[%c0_8, %c0_9, %c0_10], %14 {strides = array<i32>} : memref<1x128x128xf32, #tpu.memory_space<vmem>>, vector<1x128x128xf32>,
    return
  }
  func.func @transform_0(%arg0: i32, %arg1: i32) -> (i32, i32, i32) {
    %c0_i32 = arith.constant 0 : i32
    %c0_i32_0 = arith.constant 0 : i32
    return %arg0, %arg1, %c0_i32 : i32, i32, i32
  }
  func.func @transform_1(%arg0: i32, %arg1: i32) -> (i32, i32) {
    %c0_i32 = arith.constant 0 : i32
    %c0_i32_0 = arith.constant 0 : i32
    %c0_i32_1 = arith.constant 0 : i32
    return %c0_i32, %c0_i32_0 : i32, i32
  }
  func.func @transform_2(%arg0: i32, %arg1: i32) -> (i32, i32) {
    %c0_i32 = arith.constant 0 : i32
    %c0_i32_0 = arith.constant 0 : i32
    %c0_i32_1 = arith.constant 0 : i32
    return %c0_i32, %c0_i32_0 : i32, i32
  }
  func.func @transform_3(%arg0: i32, %arg1: i32) -> (i32, i32, i32) {
    %c0_i32 = arith.constant 0 : i32
    %c0_i32_0 = arith.constant 0 : i32
    return %arg0, %arg1, %c0_i32 : i32, i32, i32
  }
}

module attributes {stable_mosaic.version = 11 : i64} {
  func.func @_conv_mm_kernel(%arg0: i32, %arg1: i32, %arg2: memref<1x32x72xbf16, #tpu.memory_space<vmem>>, %arg3: memref<72x128xbf16, #tpu.memory_space<vmem>>, %arg4: memref<1x128xf32, #tpu.memory_space<vmem>>, %arg5: memref<1x32x128xf32, #tpu.memory_space<vmem>>) attributes {dimension_semantics = [#tpu.dimension_semantics<parallel>, #tpu.dimension_semantics<parallel>], iteration_bounds = array<i64: 2, 1>, scalar_prefetch = 0 : i64, scratch_operands = 0 : i64, tpu.core_type = #tpu.core_type<tc>, window_params = [{transform_indices = @transform_0, window_bounds = array<i64: 1, 32, 72>}, {pipeline_mode = #tpu.pipeline_mode<synchronous>, transform_indices = @transform_1, window_bounds = array<i64: 72, 128>}, {pipeline_mode = #tpu.pipeline_mode<synchronous>, transform_indices = @transform_2, window_bounds = array<i64: 1, 128>}, {transform_indices = @transform_3, window_bounds = array<i64: 1, 32, 128>}]} {
    %c0 = arith.constant 0 : index
    %c0_0 = arith.constant 0 : index
    %c0_1 = arith.constant 0 : index
    %0 = vector.load %arg2[%c0, %c0_0, %c0_1] : memref<1x32x72xbf16, #tpu.memory_space<vmem>>, vector<1x32x72xbf16>
    %1 = vector.shape_cast %0 : vector<1x32x72xbf16> to vector<32x72xbf16>
    %c0_2 = arith.constant 0 : index
    %c0_3 = arith.constant 0 : index
    %2 = vector.load %arg3[%c0_2, %c0_3] : memref<72x128xbf16, #tpu.memory_space<vmem>>, vector<72x128xbf16>
    %cst = arith.constant dense<0.000000e+00> : vector<32x128xf32>
    %3 = tpu.matmul %1, %2, %cst {dimension_numbers = #tpu.dot_dimension_numbers<[1], [0], [0], [1], [0, 0, 1, 1], [], []>} : vector<32x72xbf16>, vector<72x128xbf16>, vector<32x128xf32> -> vector<32x128xf32>
    %c0_4 = arith.constant 0 : index
    %c0_5 = arith.constant 0 : index
    %4 = vector.load %arg4[%c0_4, %c0_5] : memref<1x128xf32, #tpu.memory_space<vmem>>, vector<1x128xf32>
    %5 = vector.broadcast %4 : vector<1x128xf32> to vector<32x128xf32>
    %6 = arith.addf %3, %5 : vector<32x128xf32>
    %cst_6 = arith.constant 0.000000e+00 : f32
    %7 = vector.broadcast %cst_6 : f32 to vector<32x128xf32>
    %8 = arith.cmpf oge, %6, %7 : vector<32x128xf32>
    %cst_7 = arith.constant 2.000000e-01 : f32
    %9 = vector.broadcast %cst_7 : f32 to vector<32x128xf32>
    %10 = arith.mulf %9, %6 : vector<32x128xf32>
    %11 = arith.select %8, %6, %10 : vector<32x128xi1>, vector<32x128xf32>
    %c0_8 = arith.constant 0 : index
    %c0_9 = arith.constant 0 : index
    %c0_10 = arith.constant 0 : index
    %12 = vector.load %arg5[%c0_8, %c0_9, %c0_10] : memref<1x32x128xf32, #tpu.memory_space<vmem>>, vector<1x32x128xf32>
    %13 = vector.shape_cast %12 : vector<1x32x128xf32> to vector<32x128xf32>
    %14 = vector.shape_cast %11 : vector<32x128xf32> to vector<1x32x128xf32>
    tpu.vector_store %arg5[%c0_8, %c0_9, %c0_10], %14 {strides = array<i32>} : memref<1x32x128xf32, #tpu.memory_space<vmem>>, vector<1x32x128xf32>,
    return
  }
  func.func @transform_0(%arg0: i32, %arg1: i32) -> (i32, i32, i32) {
    %c0_i32 = arith.constant 0 : i32
    %c0_i32_0 = arith.constant 0 : i32
    return %arg0, %arg1, %c0_i32 : i32, i32, i32
  }
  func.func @transform_1(%arg0: i32, %arg1: i32) -> (i32, i32) {
    %c0_i32 = arith.constant 0 : i32
    %c0_i32_0 = arith.constant 0 : i32
    %c0_i32_1 = arith.constant 0 : i32
    return %c0_i32, %c0_i32_0 : i32, i32
  }
  func.func @transform_2(%arg0: i32, %arg1: i32) -> (i32, i32) {
    %c0_i32 = arith.constant 0 : i32
    %c0_i32_0 = arith.constant 0 : i32
    %c0_i32_1 = arith.constant 0 : i32
    return %c0_i32, %c0_i32_0 : i32, i32
  }
  func.func @transform_3(%arg0: i32, %arg1: i32) -> (i32, i32, i32) {
    %c0_i32 = arith.constant 0 : i32
    %c0_i32_0 = arith.constant 0 : i32
    return %arg0, %arg1, %c0_i32 : i32, i32, i32
  }
}

module attributes {stable_mosaic.version = 11 : i64} {
  func.func @_conv_mm_kernel(%arg0: i32, %arg1: i32, %arg2: memref<1x8x144xbf16, #tpu.memory_space<vmem>>, %arg3: memref<144x128xbf16, #tpu.memory_space<vmem>>, %arg4: memref<1x128xf32, #tpu.memory_space<vmem>>, %arg5: memref<1x8x128xf32, #tpu.memory_space<vmem>>) attributes {dimension_semantics = [#tpu.dimension_semantics<parallel>, #tpu.dimension_semantics<parallel>], iteration_bounds = array<i64: 2, 1>, scalar_prefetch = 0 : i64, scratch_operands = 0 : i64, tpu.core_type = #tpu.core_type<tc>, window_params = [{transform_indices = @transform_0, window_bounds = array<i64: 1, 8, 144>}, {pipeline_mode = #tpu.pipeline_mode<synchronous>, transform_indices = @transform_1, window_bounds = array<i64: 144, 128>}, {pipeline_mode = #tpu.pipeline_mode<synchronous>, transform_indices = @transform_2, window_bounds = array<i64: 1, 128>}, {transform_indices = @transform_3, window_bounds = array<i64: 1, 8, 128>}]} {
    %c0 = arith.constant 0 : index
    %c0_0 = arith.constant 0 : index
    %c0_1 = arith.constant 0 : index
    %0 = vector.load %arg2[%c0, %c0_0, %c0_1] : memref<1x8x144xbf16, #tpu.memory_space<vmem>>, vector<1x8x144xbf16>
    %1 = vector.shape_cast %0 : vector<1x8x144xbf16> to vector<8x144xbf16>
    %c0_2 = arith.constant 0 : index
    %c0_3 = arith.constant 0 : index
    %2 = vector.load %arg3[%c0_2, %c0_3] : memref<144x128xbf16, #tpu.memory_space<vmem>>, vector<144x128xbf16>
    %cst = arith.constant dense<0.000000e+00> : vector<8x128xf32>
    %3 = tpu.matmul %1, %2, %cst {dimension_numbers = #tpu.dot_dimension_numbers<[1], [0], [0], [1], [0, 0, 1, 1], [], []>} : vector<8x144xbf16>, vector<144x128xbf16>, vector<8x128xf32> -> vector<8x128xf32>
    %c0_4 = arith.constant 0 : index
    %c0_5 = arith.constant 0 : index
    %4 = vector.load %arg4[%c0_4, %c0_5] : memref<1x128xf32, #tpu.memory_space<vmem>>, vector<1x128xf32>
    %5 = vector.broadcast %4 : vector<1x128xf32> to vector<8x128xf32>
    %6 = arith.addf %3, %5 : vector<8x128xf32>
    %cst_6 = arith.constant 0.000000e+00 : f32
    %7 = vector.broadcast %cst_6 : f32 to vector<8x128xf32>
    %8 = arith.cmpf oge, %6, %7 : vector<8x128xf32>
    %cst_7 = arith.constant 2.000000e-01 : f32
    %9 = vector.broadcast %cst_7 : f32 to vector<8x128xf32>
    %10 = arith.mulf %9, %6 : vector<8x128xf32>
    %11 = arith.select %8, %6, %10 : vector<8x128xi1>, vector<8x128xf32>
    %c0_8 = arith.constant 0 : index
    %c0_9 = arith.constant 0 : index
    %c0_10 = arith.constant 0 : index
    %12 = vector.load %arg5[%c0_8, %c0_9, %c0_10] : memref<1x8x128xf32, #tpu.memory_space<vmem>>, vector<1x8x128xf32>
    %13 = vector.shape_cast %12 : vector<1x8x128xf32> to vector<8x128xf32>
    %14 = vector.shape_cast %11 : vector<8x128xf32> to vector<1x8x128xf32>
    tpu.vector_store %arg5[%c0_8, %c0_9, %c0_10], %14 {strides = array<i32>} : memref<1x8x128xf32, #tpu.memory_space<vmem>>, vector<1x8x128xf32>,
    return
  }
  func.func @transform_0(%arg0: i32, %arg1: i32) -> (i32, i32, i32) {
    %c0_i32 = arith.constant 0 : i32
    %c0_i32_0 = arith.constant 0 : i32
    return %arg0, %arg1, %c0_i32 : i32, i32, i32
  }
  func.func @transform_1(%arg0: i32, %arg1: i32) -> (i32, i32) {
    %c0_i32 = arith.constant 0 : i32
    %c0_i32_0 = arith.constant 0 : i32
    %c0_i32_1 = arith.constant 0 : i32
    return %c0_i32, %c0_i32_0 : i32, i32
  }
  func.func @transform_2(%arg0: i32, %arg1: i32) -> (i32, i32) {
    %c0_i32 = arith.constant 0 : i32
    %c0_i32_0 = arith.constant 0 : i32
    %c0_i32_1 = arith.constant 0 : i32
    return %c0_i32, %c0_i32_0 : i32, i32
  }
  func.func @transform_3(%arg0: i32, %arg1: i32) -> (i32, i32, i32) {
    %c0_i32 = arith.constant 0 : i32
    %c0_i32_0 = arith.constant 0 : i32
    return %arg0, %arg1, %c0_i32 : i32, i32, i32
  }
}

module attributes {stable_mosaic.version = 11 : i64} {
  func.func @_sse_kernel(%arg0: i32, %arg1: i32, %arg2: memref<2x8x128xf32, #tpu.memory_space<vmem>>, %arg3: memref<8x1xf32, #tpu.memory_space<vmem>>, %arg4: memref<1x8x128xf32, #tpu.memory_space<vmem>>) attributes {dimension_semantics = [#tpu.dimension_semantics<parallel>, #tpu.dimension_semantics<arbitrary>], iteration_bounds = array<i64: 1, 1>, scalar_prefetch = 0 : i64, scratch_operands = 0 : i64, tpu.core_type = #tpu.core_type<tc>, window_params = [{transform_indices = @transform_0, window_bounds = array<i64: 2, 8, 128>}, {transform_indices = @transform_1, window_bounds = array<i64: 8, 1>}, {transform_indices = @transform_2, window_bounds = array<i64: 1, 8, 128>}]} {
    %c0_i32 = arith.constant 0 : i32
    %0 = arith.cmpi eq, %arg1, %c0_i32 : i32
    %1 = arith.extui %0 : i1 to i32
    %c0_i32_0 = arith.constant 0 : i32
    %2 = arith.cmpi ne, %1, %c0_i32_0 : i32
    scf.if %2 {
      %cst = arith.constant 0.000000e+00 : f32
      %18 = vector.broadcast %cst : f32 to vector<8x128xf32>
      %c0_13 = arith.constant 0 : index
      %c0_14 = arith.constant 0 : index
      %c0_15 = arith.constant 0 : index
      %19 = vector.load %arg4[%c0_13, %c0_14, %c0_15] : memref<1x8x128xf32, #tpu.memory_space<vmem>>, vector<1x8x128xf32>
      %20 = vector.shape_cast %19 : vector<1x8x128xf32> to vector<8x128xf32>
      %21 = vector.shape_cast %18 : vector<8x128xf32> to vector<1x8x128xf32>
      tpu.vector_store %arg4[%c0_13, %c0_14, %c0_15], %21 {strides = array<i32>} : memref<1x8x128xf32, #tpu.memory_space<vmem>>, vector<1x8x128xf32>,
    } else {
    }
    %c0 = arith.constant 0 : index
    %c0_1 = arith.constant 0 : index
    %c0_2 = arith.constant 0 : index
    %3 = vector.load %arg2[%c0, %c0_1, %c0_2] : memref<2x8x128xf32, #tpu.memory_space<vmem>>, vector<1x8x128xf32>
    %4 = vector.shape_cast %3 : vector<1x8x128xf32> to vector<8x128xf32>
    %c1 = arith.constant 1 : index
    %c0_3 = arith.constant 0 : index
    %c0_4 = arith.constant 0 : index
    %5 = vector.load %arg2[%c1, %c0_3, %c0_4] : memref<2x8x128xf32, #tpu.memory_space<vmem>>, vector<1x8x128xf32>
    %6 = vector.shape_cast %5 : vector<1x8x128xf32> to vector<8x128xf32>
    %7 = arith.subf %4, %6 : vector<8x128xf32>
    %c0_5 = arith.constant 0 : index
    %c0_6 = arith.constant 0 : index
    %c0_7 = arith.constant 0 : index
    %8 = vector.load %arg4[%c0_5, %c0_6, %c0_7] : memref<1x8x128xf32, #tpu.memory_space<vmem>>, vector<1x8x128xf32>
    %9 = vector.shape_cast %8 : vector<1x8x128xf32> to vector<8x128xf32>
    %10 = arith.mulf %7, %7 : vector<8x128xf32>
    %c0_8 = arith.constant 0 : index
    %c0_9 = arith.constant 0 : index
    %11 = vector.load %arg3[%c0_8, %c0_9] : memref<8x1xf32, #tpu.memory_space<vmem>>, vector<8x1xf32>
    %12 = vector.broadcast %11 : vector<8x1xf32> to vector<8x128xf32>
    %13 = arith.mulf %10, %12 : vector<8x128xf32>
    %14 = arith.addf %9, %13 : vector<8x128xf32>
    %c0_10 = arith.constant 0 : index
    %c0_11 = arith.constant 0 : index
    %c0_12 = arith.constant 0 : index
    %15 = vector.load %arg4[%c0_10, %c0_11, %c0_12] : memref<1x8x128xf32, #tpu.memory_space<vmem>>, vector<1x8x128xf32>
    %16 = vector.shape_cast %15 : vector<1x8x128xf32> to vector<8x128xf32>
    %17 = vector.shape_cast %14 : vector<8x128xf32> to vector<1x8x128xf32>
    tpu.vector_store %arg4[%c0_10, %c0_11, %c0_12], %17 {strides = array<i32>} : memref<1x8x128xf32, #tpu.memory_space<vmem>>, vector<1x8x128xf32>,
    return
  }
  func.func @transform_0(%arg0: i32, %arg1: i32) -> (i32, i32, i32) {
    %c1_i32 = arith.constant 1 : i32
    %0 = arith.muli %arg0, %c1_i32 : i32
    %1 = arith.addi %0, %arg1 : i32
    %c0_i32 = arith.constant 0 : i32
    %c0_i32_0 = arith.constant 0 : i32
    %c0_i32_1 = arith.constant 0 : i32
    return %c0_i32, %1, %c0_i32_0 : i32, i32, i32
  }
  func.func @transform_1(%arg0: i32, %arg1: i32) -> (i32, i32) {
    %c1_i32 = arith.constant 1 : i32
    %0 = arith.muli %arg0, %c1_i32 : i32
    %1 = arith.addi %0, %arg1 : i32
    %c0_i32 = arith.constant 0 : i32
    %c0_i32_0 = arith.constant 0 : i32
    return %1, %c0_i32 : i32, i32
  }
  func.func @transform_2(%arg0: i32, %arg1: i32) -> (i32, i32, i32) {
    %c0_i32 = arith.constant 0 : i32
    %c0_i32_0 = arith.constant 0 : i32
    %c0_i32_1 = arith.constant 0 : i32
    return %arg0, %c0_i32, %c0_i32_0 : i32, i32, i32
  }
}

module attributes {stable_mosaic.version = 11 : i64} {
  func.func @_sse_kernel(%arg0: i32, %arg1: i32, %arg2: memref<2x32x128xf32, #tpu.memory_space<vmem>>, %arg3: memref<32x1xf32, #tpu.memory_space<vmem>>, %arg4: memref<1x32x128xf32, #tpu.memory_space<vmem>>) attributes {dimension_semantics = [#tpu.dimension_semantics<parallel>, #tpu.dimension_semantics<arbitrary>], iteration_bounds = array<i64: 1, 1>, scalar_prefetch = 0 : i64, scratch_operands = 0 : i64, tpu.core_type = #tpu.core_type<tc>, window_params = [{transform_indices = @transform_0, window_bounds = array<i64: 2, 32, 128>}, {transform_indices = @transform_1, window_bounds = array<i64: 32, 1>}, {transform_indices = @transform_2, window_bounds = array<i64: 1, 32, 128>}]} {
    %c0_i32 = arith.constant 0 : i32
    %0 = arith.cmpi eq, %arg1, %c0_i32 : i32
    %1 = arith.extui %0 : i1 to i32
    %c0_i32_0 = arith.constant 0 : i32
    %2 = arith.cmpi ne, %1, %c0_i32_0 : i32
    scf.if %2 {
      %cst = arith.constant 0.000000e+00 : f32
      %18 = vector.broadcast %cst : f32 to vector<32x128xf32>
      %c0_13 = arith.constant 0 : index
      %c0_14 = arith.constant 0 : index
      %c0_15 = arith.constant 0 : index
      %19 = vector.load %arg4[%c0_13, %c0_14, %c0_15] : memref<1x32x128xf32, #tpu.memory_space<vmem>>, vector<1x32x128xf32>
      %20 = vector.shape_cast %19 : vector<1x32x128xf32> to vector<32x128xf32>
      %21 = vector.shape_cast %18 : vector<32x128xf32> to vector<1x32x128xf32>
      tpu.vector_store %arg4[%c0_13, %c0_14, %c0_15], %21 {strides = array<i32>} : memref<1x32x128xf32, #tpu.memory_space<vmem>>, vector<1x32x128xf32>,
    } else {
    }
    %c0 = arith.constant 0 : index
    %c0_1 = arith.constant 0 : index
    %c0_2 = arith.constant 0 : index
    %3 = vector.load %arg2[%c0, %c0_1, %c0_2] : memref<2x32x128xf32, #tpu.memory_space<vmem>>, vector<1x32x128xf32>
    %4 = vector.shape_cast %3 : vector<1x32x128xf32> to vector<32x128xf32>
    %c1 = arith.constant 1 : index
    %c0_3 = arith.constant 0 : index
    %c0_4 = arith.constant 0 : index
    %5 = vector.load %arg2[%c1, %c0_3, %c0_4] : memref<2x32x128xf32, #tpu.memory_space<vmem>>, vector<1x32x128xf32>
    %6 = vector.shape_cast %5 : vector<1x32x128xf32> to vector<32x128xf32>
    %7 = arith.subf %4, %6 : vector<32x128xf32>
    %c0_5 = arith.constant 0 : index
    %c0_6 = arith.constant 0 : index
    %c0_7 = arith.constant 0 : index
    %8 = vector.load %arg4[%c0_5, %c0_6, %c0_7] : memref<1x32x128xf32, #tpu.memory_space<vmem>>, vector<1x32x128xf32>
    %9 = vector.shape_cast %8 : vector<1x32x128xf32> to vector<32x128xf32>
    %10 = arith.mulf %7, %7 : vector<32x128xf32>
    %c0_8 = arith.constant 0 : index
    %c0_9 = arith.constant 0 : index
    %11 = vector.load %arg3[%c0_8, %c0_9] : memref<32x1xf32, #tpu.memory_space<vmem>>, vector<32x1xf32>
    %12 = vector.broadcast %11 : vector<32x1xf32> to vector<32x128xf32>
    %13 = arith.mulf %10, %12 : vector<32x128xf32>
    %14 = arith.addf %9, %13 : vector<32x128xf32>
    %c0_10 = arith.constant 0 : index
    %c0_11 = arith.constant 0 : index
    %c0_12 = arith.constant 0 : index
    %15 = vector.load %arg4[%c0_10, %c0_11, %c0_12] : memref<1x32x128xf32, #tpu.memory_space<vmem>>, vector<1x32x128xf32>
    %16 = vector.shape_cast %15 : vector<1x32x128xf32> to vector<32x128xf32>
    %17 = vector.shape_cast %14 : vector<32x128xf32> to vector<1x32x128xf32>
    tpu.vector_store %arg4[%c0_10, %c0_11, %c0_12], %17 {strides = array<i32>} : memref<1x32x128xf32, #tpu.memory_space<vmem>>, vector<1x32x128xf32>,
    return
  }
  func.func @transform_0(%arg0: i32, %arg1: i32) -> (i32, i32, i32) {
    %c1_i32 = arith.constant 1 : i32
    %0 = arith.muli %arg0, %c1_i32 : i32
    %1 = arith.addi %0, %arg1 : i32
    %c0_i32 = arith.constant 0 : i32
    %c0_i32_0 = arith.constant 0 : i32
    %c0_i32_1 = arith.constant 0 : i32
    return %c0_i32, %1, %c0_i32_0 : i32, i32, i32
  }
  func.func @transform_1(%arg0: i32, %arg1: i32) -> (i32, i32) {
    %c1_i32 = arith.constant 1 : i32
    %0 = arith.muli %arg0, %c1_i32 : i32
    %1 = arith.addi %0, %arg1 : i32
    %c0_i32 = arith.constant 0 : i32
    %c0_i32_0 = arith.constant 0 : i32
    return %1, %c0_i32 : i32, i32
  }
  func.func @transform_2(%arg0: i32, %arg1: i32) -> (i32, i32, i32) {
    %c0_i32 = arith.constant 0 : i32
    %c0_i32_0 = arith.constant 0 : i32
    %c0_i32_1 = arith.constant 0 : i32
    return %arg0, %c0_i32, %c0_i32_0 : i32, i32, i32
  }
}

module attributes {stable_mosaic.version = 11 : i64} {
  func.func @_sse_kernel(%arg0: i32, %arg1: i32, %arg2: memref<2x128x128xf32, #tpu.memory_space<vmem>>, %arg3: memref<128x1xf32, #tpu.memory_space<vmem>>, %arg4: memref<1x128x128xf32, #tpu.memory_space<vmem>>) attributes {dimension_semantics = [#tpu.dimension_semantics<parallel>, #tpu.dimension_semantics<arbitrary>], iteration_bounds = array<i64: 1, 1>, scalar_prefetch = 0 : i64, scratch_operands = 0 : i64, tpu.core_type = #tpu.core_type<tc>, window_params = [{transform_indices = @transform_0, window_bounds = array<i64: 2, 128, 128>}, {transform_indices = @transform_1, window_bounds = array<i64: 128, 1>}, {transform_indices = @transform_2, window_bounds = array<i64: 1, 128, 128>}]} {
    %c0_i32 = arith.constant 0 : i32
    %0 = arith.cmpi eq, %arg1, %c0_i32 : i32
    %1 = arith.extui %0 : i1 to i32
    %c0_i32_0 = arith.constant 0 : i32
    %2 = arith.cmpi ne, %1, %c0_i32_0 : i32
    scf.if %2 {
      %cst = arith.constant 0.000000e+00 : f32
      %18 = vector.broadcast %cst : f32 to vector<128x128xf32>
      %c0_13 = arith.constant 0 : index
      %c0_14 = arith.constant 0 : index
      %c0_15 = arith.constant 0 : index
      %19 = vector.load %arg4[%c0_13, %c0_14, %c0_15] : memref<1x128x128xf32, #tpu.memory_space<vmem>>, vector<1x128x128xf32>
      %20 = vector.shape_cast %19 : vector<1x128x128xf32> to vector<128x128xf32>
      %21 = vector.shape_cast %18 : vector<128x128xf32> to vector<1x128x128xf32>
      tpu.vector_store %arg4[%c0_13, %c0_14, %c0_15], %21 {strides = array<i32>} : memref<1x128x128xf32, #tpu.memory_space<vmem>>, vector<1x128x128xf32>,
    } else {
    }
    %c0 = arith.constant 0 : index
    %c0_1 = arith.constant 0 : index
    %c0_2 = arith.constant 0 : index
    %3 = vector.load %arg2[%c0, %c0_1, %c0_2] : memref<2x128x128xf32, #tpu.memory_space<vmem>>, vector<1x128x128xf32>
    %4 = vector.shape_cast %3 : vector<1x128x128xf32> to vector<128x128xf32>
    %c1 = arith.constant 1 : index
    %c0_3 = arith.constant 0 : index
    %c0_4 = arith.constant 0 : index
    %5 = vector.load %arg2[%c1, %c0_3, %c0_4] : memref<2x128x128xf32, #tpu.memory_space<vmem>>, vector<1x128x128xf32>
    %6 = vector.shape_cast %5 : vector<1x128x128xf32> to vector<128x128xf32>
    %7 = arith.subf %4, %6 : vector<128x128xf32>
    %c0_5 = arith.constant 0 : index
    %c0_6 = arith.constant 0 : index
    %c0_7 = arith.constant 0 : index
    %8 = vector.load %arg4[%c0_5, %c0_6, %c0_7] : memref<1x128x128xf32, #tpu.memory_space<vmem>>, vector<1x128x128xf32>
    %9 = vector.shape_cast %8 : vector<1x128x128xf32> to vector<128x128xf32>
    %10 = arith.mulf %7, %7 : vector<128x128xf32>
    %c0_8 = arith.constant 0 : index
    %c0_9 = arith.constant 0 : index
    %11 = vector.load %arg3[%c0_8, %c0_9] : memref<128x1xf32, #tpu.memory_space<vmem>>, vector<128x1xf32>
    %12 = vector.broadcast %11 : vector<128x1xf32> to vector<128x128xf32>
    %13 = arith.mulf %10, %12 : vector<128x128xf32>
    %14 = arith.addf %9, %13 : vector<128x128xf32>
    %c0_10 = arith.constant 0 : index
    %c0_11 = arith.constant 0 : index
    %c0_12 = arith.constant 0 : index
    %15 = vector.load %arg4[%c0_10, %c0_11, %c0_12] : memref<1x128x128xf32, #tpu.memory_space<vmem>>, vector<1x128x128xf32>
    %16 = vector.shape_cast %15 : vector<1x128x128xf32> to vector<128x128xf32>
    %17 = vector.shape_cast %14 : vector<128x128xf32> to vector<1x128x128xf32>
    tpu.vector_store %arg4[%c0_10, %c0_11, %c0_12], %17 {strides = array<i32>} : memref<1x128x128xf32, #tpu.memory_space<vmem>>, vector<1x128x128xf32>,
    return
  }
  func.func @transform_0(%arg0: i32, %arg1: i32) -> (i32, i32, i32) {
    %c1_i32 = arith.constant 1 : i32
    %0 = arith.muli %arg0, %c1_i32 : i32
    %1 = arith.addi %0, %arg1 : i32
    %c0_i32 = arith.constant 0 : i32
    %c0_i32_0 = arith.constant 0 : i32
    %c0_i32_1 = arith.constant 0 : i32
    return %c0_i32, %1, %c0_i32_0 : i32, i32, i32
  }
  func.func @transform_1(%arg0: i32, %arg1: i32) -> (i32, i32) {
    %c1_i32 = arith.constant 1 : i32
    %0 = arith.muli %arg0, %c1_i32 : i32
    %1 = arith.addi %0, %arg1 : i32
    %c0_i32 = arith.constant 0 : i32
    %c0_i32_0 = arith.constant 0 : i32
    return %1, %c0_i32 : i32, i32
  }
  func.func @transform_2(%arg0: i32, %arg1: i32) -> (i32, i32, i32) {
    %c0_i32 = arith.constant 0 : i32
    %c0_i32_0 = arith.constant 0 : i32
    %c0_i32_1 = arith.constant 0 : i32
    return %arg0, %c0_i32, %c0_i32_0 : i32, i32, i32
  }
}

</mosaic_0001>

<bundles_post_ra>
// kernel: feature_matching_loss.6
= control target key start
LH: loop header
LB: loop body
LE: loop exit
PB: predicated region body
PF: predicated region fallthrough
CT: control target
= control target key end

     0   :  { %8 = vsyncpa [#allocation3], 0  ;;  %s1323_s0 = inlined_call_operand.hbm [shape: bf16[2,128,27], index: 0, kind: input, shape index: {}]   ;;  %s1324_s1 = inlined_call_operand.hbm [shape: bf16[27,128], index: 1, kind: input, shape index: {}]   ;;  %s1325_s2 = inlined_call_operand.hbm [shape: f32[1,128], index: 2, kind: input, shape index: {}]   ;;  %s1326_s3 = inlined_call_operand.hbm [shape: f32[2,128,128], index: 3, kind: output, shape index: {}]  }
   0x1   :  { %10 = vsyncpa [#allocation3 + $0x1], 0 }
   0x2   :  { %11 = vsyncpa [#allocation6], 0 }
   0x3   :  { %12 = vsyncpa [#allocation4], 0 }
   0x4   :  { %14 = vsyncpa [#allocation4 + $0x1], 0  ;;  %s1005_s12 = smov 0   ;;  %s1007_s13 = smov 0  }
   0x5   :  { %s1009_s14 = smov 0   ;;  %s1011_s15 = smov 0  }
   0x6   :  { %s1013_s16 = smov 0   ;;  %s1015_s17 = smov 0  }
   0x7 LB: > { %s630_s18 = sadd.s32 4294967295, %s974_s17   ;;  %s631_s19 = sadd.s32 4294967294, %s974_s17   ;;  %s974_s17 = sphi %s1015_s17, %s20_s17   ;;  %s970_s16 = sphi %s1013_s16, %s1348_s16   ;;  %s966_s15 = sphi %s1011_s15, %s1347_s15   ;;  %s962_s14 = sphi %s1009_s14, %s1346_s14   ;;  %s958_s13 = sphi %s1007_s13, %s1345_s13   ;;  %s954_s12 = sphi %s1005_s12, %s1344_s12  }
   0x8   : > { %p54_p0 = scmp.ne.s32.totalorder %s958_s13, %s954_s12  ;;  %p1039_p1 = scmp.eq.s32.totalorder %s630_s18, 0 }
   0x9   : > { %p1043_p2 = scmp.eq.s32.totalorder %s630_s18, 1  ;;  %p128_p3 = scmp.eq.s32.totalorder %s631_s19, 1 }
   0xa   : > { %s1331_s20 = scalar_select %p1039_p1, 1, 0 }
   0xb   : > { %p1049_p4 = por %p1039_p1, %p54_p0  ;;  %p632_p5 = scmp.ge.s32.totalorder %s974_s17, 1 }
   0xc   : > { %p1054_p6 = por %p128_p3, %p54_p0  ;;  %p135_p7 = scmp.lt.s32.totalorder %s974_s17, 3 }
   0xd   : > { %s1333_s22 = scalar_select %p1049_p4, 1, 0 }
   0xe   : > { %s1334_s23 = scalar_select %p1054_p6, 1, 0 }
   0xf   : > { %p1059_p8 = pnand %p632_p5, %p135_p7  ;;  %s976_s25 = smov [#allocation5]  }
  0x10   : > { %s147_s26 = sshll.u32 %s976_s25, 4  ;;  %s977_s28 = smov [#allocation7]   ;;  %s1063_s26 = int_to_ptr.vmem [resolvable:$true] %s147_s26 }
  0x11   : > { %p716_p9 = pneg %p1059_p8  ;;  %s161_s29 = sshll.u32 %s977_s28, 4  ;;  %s1074_s29 = int_to_ptr.vmem [resolvable:$true] %s161_s29 }
  0x12   : > { %s802_s5 = scalar_lea.hbm %s1324_s1, 256 }
  0x13   : > { %p1070_p11 = pnand %p716_p9, %p1039_p1  ;;  %p803_p12 = scmp.ne.s32.totalorder %s1324_s1, %s802_s5 }
  0x14   : > { %p809_p5 = scmp.lt.u32.totalorder %s802_s5, %s1324_s1 }
  0x15   : > { %p804_p13 = pneg %p1070_p11 }
  0x17   : > { %p805_p0 = pnand %p804_p13, %p803_p12 }
  0x19   : > { %p806_p3 = pneg %p805_p0 }
  0x1b   : > { %p811_p7 = pnand %p809_p5, %p806_p3 }
  0x1d   : > { %814 = shalt.err (!%p811_p7)
}
  0x1e   : > { %s815_s10 = scalar_lea.vmem %s1063_s26, 256  ;;  %p823_p1 = scmp.lt.s32.totalorder %s1063_s26, %s1063_s26 }
  0x1f   : > { %p816_p9 = scmp.ne.s32.totalorder %s1063_s26, %s815_s10  ;;  %p824_p12 = scmp.lt.s32.totalorder %s815_s10, %s815_s10 }
  0x21   : > { %p818_p10 = pnand %p816_p9, %p804_p13  ;;  %p825_p0 = por %p824_p12, %p823_p1 }
  0x23   : > { %p819_p6 = pneg %p818_p10 }
  0x25   : > { %p826_p4 = pnand %p825_p0, %p819_p6 }
  0x27   : > { %829 = shalt.err (!%p826_p4)
}
  0x28   : > { %s978_s11 = smov 64   ;;  %s979_s18 = smov 4  }
  0x29   : > { %719 = dma.hbm_to_vmem [thread:$0]  (!%p1070_p11), %s1324_s1, 256, %s1063_s26, [#allocation6], %s978_s11, %s978_s11, %s979_s18  }
  0x2a   : > { %s830_s4 = scalar_lea.hbm %s1325_s2, 16 }
  0x2b   : > { %p831_p1 = scmp.ne.s32.totalorder %s1325_s2, %s830_s4  ;;  %p837_p10 = scmp.lt.u32.totalorder %s830_s4, %s1325_s2 }
  0x2d   : > { %p833_p4 = pnand %p831_p1, %p804_p13 }
  0x2f   : > { %p834_p6 = pneg %p833_p4 }
  0x31   : > { %p839_p3 = pnand %p837_p10, %p834_p6 }
  0x33   : > { %842 = shalt.err (!%p839_p3)
}
  0x34   : > { %s843_s26 = scalar_lea.vmem %s1074_s29, 16  ;;  %s850_s9 = scalar_lea.vmem %s1074_s29, 32 }
  0x35   : > { %p844_p5 = scmp.ne.s32.totalorder %s1074_s29, %s843_s26  ;;  %p851_p12 = scmp.lt.s32.totalorder %s1074_s29, %s1074_s29 }
  0x36   : > { %p852_p0 = scmp.lt.s32.totalorder %s850_s9, %s843_s26 }
  0x37   : > { %p846_p7 = pnand %p844_p5, %p804_p13 }
  0x38   : > { %p853_p1 = por %p852_p0, %p851_p12 }
  0x39   : > { %p847_p9 = pneg %p846_p7 }
  0x3b   : > { %p854_p4 = pnand %p853_p1, %p847_p9 }
  0x3d   : > { %857 = shalt.err (!%p854_p4)
}
  0x3e   : > { %722 = dma.hbm_to_vmem [thread:$0]  (!%p1070_p11), %s1325_s2, 16, %s1074_s29, [#allocation6]  }
  0x3f   : > { %s32_s25 = sadd.s32 1, %s970_s16  ;;  %s41_s28 = sadd.s32 1, %s962_s14 }
  0x40   : > { %p34_p13 = scmp.ge.s32.totalorder %s32_s25, 2  ;;  %p48_p6 = scmp.ne.s32.totalorder %s962_s14, %s958_s13 }
  0x41   : > { %p49_p10 = scmp.eq.s32.totalorder %s974_s17, 0  ;;  %p733_p3 = scmp.lt.s32.totalorder %s974_s17, 2 }
  0x42   : > { %s1350_s25 = smov (%p34_p13, %s32_s25), 0  ;;  %p1142_p7 = por %p1043_p2, %p48_p6 }
  0x43   : > { %p50_p5 = por %p49_p10, %p48_p6  ;;  %s36_s30 = ssub.s32 %s970_s16, %s1350_s25 }
  0x44   : > { %s1337_s27 = scalar_select %p1142_p7, 1, 0 }
  0x45   : > { %s172_s4 = sand.u32 1, %s962_s14   ;;  %p39_p9 = scmp.eq.s32.totalorder %s36_s30, 0 }
  0x46   : > { %s636_s29 = sshll.u32 %s172_s4, 6  ;;  %s668_s5 = sshll.u32 %s970_s16, 10 }
  0x47   : > { %s1151_s6 = scalar_select %p39_p9, %s962_s14, %s41_s28  }
  0x48   : > { %s1156_s26 = scalar_lea.hbm %s1323_s0, %s668_s5  ;;  %s176_s21 = scalar_lea.vmem [#allocation2], %s636_s29 }
  0x49   : > { %s185_s9 = sshll.u32 %s176_s21, 4  ;;  %p1160_p2 = pnand %p733_p3, %p50_p5  ;;  %s1164_s9 = int_to_ptr.vmem [resolvable:$true] %s185_s9 }
  0x4a   : > { %s1166_s19 = scalar_lea.sflag [#allocation3], %s172_s4  ;;  %s858_s28 = scalar_lea.hbm %s1156_s26, 1024 }
  0x4b   : > { %p859_p11 = scmp.ne.s32.totalorder %s1156_s26, %s858_s28  ;;  %p860_p12 = pneg %p1160_p2 }
  0x4c   : > { %s863_s5 = scalar_lea.hbm %s1323_s0, 2048  ;;  %p864_p4 = scmp.lt.u32.totalorder %s1156_s26, %s1323_s0 }
  0x4d   : > { %p861_p0 = pnand %p860_p12, %p859_p11  ;;  %p865_p13 = scmp.lt.u32.totalorder %s863_s5, %s858_s28 }
  0x4e   : > { %p867_p10 = scmp.lt.u32.totalorder %s858_s28, %s1156_s26 }
  0x4f   : > { %p862_p1 = pneg %p861_p0  ;;  %p866_p6 = por %p865_p13, %p864_p4 }
  0x51   : > { %p868_p3 = por %p867_p10, %p866_p6 }
  0x53   : > { %p869_p5 = pnand %p868_p3, %p862_p1 }
  0x55   : > { %872 = shalt.err (!%p869_p5)
}
  0x56   : > { %s873_s4 = scalar_lea.vmem %s1164_s9, 1024  ;;  %s980_s21 = smov [#allocation2]  }
  0x57   : > { %p874_p9 = scmp.ne.s32.totalorder %s1164_s9, %s873_s4  ;;  %s878_s30 = sshll.u32 %s980_s21, 4  ;;  %s879_s30 = int_to_ptr.vmem [resolvable:$false] %s878_s30 }
  0x58   : > { %s880_s29 = scalar_lea.vmem %s879_s30, 2048  ;;  %p881_p7 = scmp.lt.s32.totalorder %s1164_s9, %s879_s30 }
  0x59   : > { %p876_p11 = pnand %p874_p9, %p860_p12  ;;  %p882_p4 = scmp.lt.s32.totalorder %s880_s29, %s873_s4 }
  0x5b   : > { %p877_p0 = pneg %p876_p11  ;;  %p883_p13 = por %p882_p4, %p881_p7 }
  0x5d   : > { %p884_p6 = pnand %p883_p13, %p877_p0 }
  0x5f   : > { %887 = shalt.err (!%p884_p6)
}
  0x60   : > { %726 = dma.hbm_to_vmem [thread:$0]  (!%p1160_p2), %s1156_s26, 1024, %s1164_s9, %s1166_s19, %s978_s11, %s978_s11, %s979_s18  }
  0x61   : > { %197 = sbr.rel (%p1059_p8) target bundleno = 364 (0x16c), region = 32  ;;  %s1200_s28 = sand.u32 (!%p1059_p8), 1, %s958_s13  }
  0x62   : > { %s640_s5 = sshll.u32 (!%p1059_p8), %s1200_s28, 6  ;;  %s200_s7 = scalar_lea.sflag (!%p1059_p8), [#allocation3], %s1200_s28 }
  0x63   : > { %s1204_s8 = scalar_lea.vmem (!%p1059_p8), [#allocation2], %s640_s5  ;;  %p1339_p7 = scmp.ne.s32.totalorder (!%p1059_p8), %s1333_s22, 0 }
  0x68   : > { %941 = dma.done.wait (%p1339_p7), %s200_s7, 1024  }
  0x69   : > { %943 = vsyncadd (%p1339_p7), %s200_s7, 4294966272  ;;  %p1340_p2 = scmp.ne.s32.totalorder %s1331_s20, 0 }
  0x6b   : > { %945 = dma.done.wait (%p1340_p2), [#allocation6], 272  }
  0x6c   : > { %947 = vsyncadd (%p1340_p2), [#allocation6], 4294967024  ;;  %vm340_vm0 = vcmask 1044480   ;;  %vm341_vm1 = vcmask 1045504   ;;  %v981_v0 = vmov 65535   ;;  %vm315_vm2 = vcmask 220160  }
  0x6d   : > { %v342_v1 = vsel %vm340_vm0, 4294967295, %v981_v0  ;;  %v792_v2 = vld [vmem:[#allocation5] sm:$0xff]   ;;  %v793_v4 = vld [vmem:[#allocation5 + $0x8] sm:$0x3f]   ;;  %v798_v10 = vld [vmem:[%s1204_s8 + $0x10] sm:$0xff]   ;;  %s643_s20 = sshll.u32 %s1200_s28, 7 }
  0x6e   : > { %v343_v3 = vsel %vm341_vm1, %v342_v1, 0  ;;  %680 = vmatprep.subr.bf16.mxu0 %v792_v2  ;;  %700 = vmatprep.subr.bf16.mxu1 %v792_v2  ;;  %v794_v5 = vld [vmem:[%s1204_s8] sm:$0xff]   ;;  %v796_v8 = vld [vmem:[%s1204_s8 + $0x8] sm:$0xff]   ;;  %v799_v11 = vld [vmem:[%s1204_s8 + $0x30] sm:$0xff]   ;;  %s1239_s22 = scalar_lea.vmem [#allocation8], %s643_s20  ;;  %s669_s24 = sshll.u32 %s966_s15, 11 }
  0x6f   : > { %681 = vmatpush3.bf16.msra.mxu0 %v792_v2  ;;  %702 = vmatpush3.bf16.msra.mxu1 %v792_v2  ;;  %v345_v6 = vand.u32 %v793_v4, %v343_v3  ;;  %v795_v7 = vld [vmem:[%s1204_s8 + $0x20] sm:$0xff]   ;;  %v797_v9 = vld [vmem:[%s1204_s8 + $0x28] sm:$0xff]   ;;  %v800_v12 = vld [vmem:[%s1204_s8 + $0x18] sm:$0xff]   ;;  %s524_s11 = sshll.u32 %s1239_s22, 4  ;;  %s1268_s26 = scalar_lea.hbm %s1326_s3, %s669_s24  ;;  %s1270_s11 = int_to_ptr.vmem [resolvable:$true] %s524_s11 }
  0x70   : > { %684 = vmatprep.mubr.msk.bf16.mxu0 %vm315_vm2, %v794_v5  ;;  %692 = vmatprep.mubr.msk.bf16.mxu1 %vm315_vm2, %v795_v7  ;;  %v801_v13 = vld [vmem:[%s1204_s8 + $0x38] sm:$0xff]   ;;  %v1230_v14 = vld [vmem:[#allocation7] ss:$0 sm:$0xff]  ;;  %s509_s9 = scalar_lea.sflag [#allocation4], %s1200_s28  ;;  %s888_s10 = scalar_lea.vmem %s1270_s11, 2048 }
  0x71   : > { %682 = vmatprep.subr.bf16.mxu0 %v345_v6  ;;  %701 = vmatprep.subr.bf16.mxu1 %v345_v6  ;;  %p889_p8 = scmp.ne.s32.totalorder %s1270_s11, %s888_s10  ;;  %p1341_p12 = scmp.ne.s32.totalorder %s1337_s27, 0 }
  0x72   : > { %s982_s19 = smov [#allocation8]  }
  0x73   : > { %683 = vmatpush3.bf16.msra.mxu0 %v345_v6  ;;  %703 = vmatpush3.bf16.msra.mxu1 %v345_v6  ;;  %p890_p1 = pnand %p889_p8, %p1341_p12  ;;  %s892_s4 = sshll.u32 %s982_s19, 4  ;;  %s893_s4 = int_to_ptr.vmem [resolvable:$false] %s892_s4 }
  0x74   : > { %s894_s21 = scalar_lea.vmem %s893_s4, 4096  ;;  %p895_p3 = scmp.lt.s32.totalorder %s1270_s11, %s893_s4 }
  0x75   : > { %p891_p10 = pneg %p890_p1  ;;  %p896_p5 = scmp.lt.s32.totalorder %s894_s21, %s888_s10 }
  0x76   : > { %685 = vmatmul.mubr.msk.bf16.vlgmr.msra.gmra.mrb[0].mxu0 %vm315_vm2, %v796_v8  ;;  %693 = vmatmul.mubr.msk.bf16.vlgmr.msra.gmra.mrb[0].mxu1 %vm315_vm2, %v797_v9 }
  0x77   : > { %688 = vmatprep.mubr.msk.bf16.mxu0 %vm315_vm2, %v798_v10  ;;  %696 = vmatprep.mubr.msk.bf16.mxu1 %vm315_vm2, %v799_v11  ;;  %p897_p9 = por %p896_p5, %p895_p3 }
  0x79   : > { %p898_p11 = pnand %p897_p9, %p891_p10 }
  0x7e   : > { %689 = vmatmul.mubr.msk.bf16.gmra.mrb[4].mxu0 %vm315_vm2, %v800_v12  ;;  %697 = vmatmul.mubr.msk.bf16.gmra.mrb[4].mxu1 %vm315_vm2, %v801_v13 }
 0x149   : > { %v686_v15 = vpop.f32.mrb[0].mxu0  ;;  %v694_v16 = vpop.f32.mrb[0].mxu1 }
 0x14a   : > { %v390_v17 = vadd.f32 %v686_v15, %v1230_v14  ;;  %v422_v18 = vadd.f32 %v694_v16, %v1230_v14  ;;  %v381_v19 = vpop.f32.mrb[1].mxu0  ;;  %v413_v20 = vpop.f32.mrb[1].mxu1 }
 0x14b   : > { %v382_v21 = vadd.f32 %v1230_v14, %v381_v19  ;;  %v414_v22 = vadd.f32 %v1230_v14, %v413_v20  ;;  %v687_v23 = vpop.f32.mrb[2].mxu0  ;;  %v695_v24 = vpop.f32.mrb[2].mxu1 }
 0x14c   : > { %vm446_vm3 = vcmp.ge.f32.partialorder %v390_v17, 0.0  ;;  %v462_v25 = vmul.f32 0.2, %v390_v17  ;;  %vm454_vm4 = vcmp.ge.f32.partialorder %v422_v18, 0.0  ;;  %v470_v26 = vmul.f32 0.2, %v422_v18 }
 0x14d   : > { %vm444_vm5 = vcmp.ge.f32.partialorder %v382_v21, 0.0  ;;  %v460_v27 = vmul.f32 0.2, %v382_v21  ;;  %vm452_vm6 = vcmp.ge.f32.partialorder %v414_v22, 0.0  ;;  %v468_v28 = vmul.f32 0.2, %v414_v22 }
 0x14e   : > { %v478_v29 = vsel %vm446_vm3, %v390_v17, %v462_v25  ;;  %v486_v30 = vsel %vm454_vm4, %v422_v18, %v470_v26  ;;  %v393_v31 = vadd.f32 %v687_v23, %v1230_v14  ;;  %v425_v32 = vadd.f32 %v695_v24, %v1230_v14  ;;  %v384_v33 = vpop.f32.mrb[3].mxu0  ;;  %v416_v34 = vpop.f32.mrb[3].mxu1 }
 0x14f   : > { %494 = vst [vmem:[%s1239_s22 + $0x10] sm:$0xff] %v478_v29  ;;  %502 = vst [vmem:[%s1239_s22 + $0x50] sm:$0xff] %v486_v30  ;;  %v476_v35 = vsel %vm444_vm5, %v382_v21, %v460_v27  ;;  %v484_v36 = vsel %vm452_vm6, %v414_v22, %v468_v28  ;;  %v385_v37 = vadd.f32 %v1230_v14, %v384_v33 }
 0x150   : > { %v417_v38 = vadd.f32 %v1230_v14, %v416_v34  ;;  %492 = vst [vmem:[%s1239_s22] sm:$0xff] %v476_v35  ;;  %500 = vst [vmem:[%s1239_s22 + $0x40] sm:$0xff] %v484_v36  ;;  %vm447_vm7 = vcmp.ge.f32.partialorder %v393_v31, 0.0  ;;  %v463_v39 = vmul.f32 0.2, %v393_v31  ;;  %vm455_vm8 = vcmp.ge.f32.partialorder %v425_v32, 0.0 }
 0x151   : > { %v471_v40 = vmul.f32 0.2, %v425_v32  ;;  %vm445_vm9 = vcmp.ge.f32.partialorder %v385_v37, 0.0  ;;  %v461_v41 = vmul.f32 0.2, %v385_v37  ;;  %v690_v45 = vpop.f32.mrb[4].mxu0 }
 0x152   : > { %vm453_vm10 = vcmp.ge.f32.partialorder %v417_v38, 0.0  ;;  %v469_v42 = vmul.f32 0.2, %v417_v38  ;;  %v479_v43 = vsel %vm447_vm7, %v393_v31, %v463_v39  ;;  %v698_v46 = vpop.f32.mrb[4].mxu1  ;;  %v406_v49 = vadd.f32 %v690_v45, %v1230_v14  ;;  %v397_v51 = vpop.f32.mrb[5].mxu0 }
 0x153   : > { %v487_v44 = vsel %vm455_vm8, %v425_v32, %v471_v40  ;;  %495 = vst [vmem:[%s1239_s22 + $0x18] sm:$0xff] %v479_v43  ;;  %v477_v47 = vsel %vm445_vm9, %v385_v37, %v461_v41  ;;  %v438_v50 = vadd.f32 %v698_v46, %v1230_v14  ;;  %v429_v52 = vpop.f32.mrb[5].mxu1  ;;  %v398_v53 = vadd.f32 %v1230_v14, %v397_v51  ;;  %v691_v55 = vpop.f32.mrb[6].mxu0 }
 0x154   : > { %503 = vst [vmem:[%s1239_s22 + $0x58] sm:$0xff] %v487_v44  ;;  %v485_v48 = vsel %vm453_vm10, %v417_v38, %v469_v42  ;;  %493 = vst [vmem:[%s1239_s22 + $0x8] sm:$0xff] %v477_v47  ;;  %v430_v54 = vadd.f32 %v1230_v14, %v429_v52  ;;  %v699_v56 = vpop.f32.mrb[6].mxu1  ;;  %vm450_vm11 = vcmp.ge.f32.partialorder %v406_v49, 0.0  ;;  %v466_v57 = vmul.f32 0.2, %v406_v49 }
 0x155   : > { %501 = vst [vmem:[%s1239_s22 + $0x48] sm:$0xff] %v485_v48  ;;  %vm458_vm12 = vcmp.ge.f32.partialorder %v438_v50, 0.0  ;;  %v474_v58 = vmul.f32 0.2, %v438_v50  ;;  %vm448_vm13 = vcmp.ge.f32.partialorder %v398_v53, 0.0  ;;  %v409_v63 = vadd.f32 %v691_v55, %v1230_v14  ;;  %v400_v1 = vpop.f32.mrb[7].mxu0 }
 0x156   : > { %v464_v59 = vmul.f32 0.2, %v398_v53  ;;  %vm456_vm14 = vcmp.ge.f32.partialorder %v430_v54, 0.0  ;;  %v472_v60 = vmul.f32 0.2, %v430_v54  ;;  %v482_v61 = vsel %vm450_vm11, %v406_v49, %v466_v57  ;;  %v432_v2 = vpop.f32.mrb[7].mxu1 }
 0x157   : > { %v490_v62 = vsel %vm458_vm12, %v438_v50, %v474_v58  ;;  %v441_v0 = vadd.f32 %v699_v56, %v1230_v14  ;;  %498 = vst [vmem:[%s1239_s22 + $0x30] sm:$0xff] %v482_v61  ;;  %v401_v5 = vadd.f32 %v1230_v14, %v400_v1  ;;  %v433_v6 = vadd.f32 %v1230_v14, %v432_v2 }
 0x158   : > { %506 = vst [vmem:[%s1239_s22 + $0x70] sm:$0xff] %v490_v62  ;;  %v480_v3 = vsel %vm448_vm13, %v398_v53, %v464_v59  ;;  %v488_v4 = vsel %vm456_vm14, %v430_v54, %v472_v60  ;;  %vm451_vm15 = vcmp.ge.f32.partialorder %v409_v63, 0.0  ;;  %v467_v7 = vmul.f32 0.2, %v409_v63 }
 0x159   : > { %496 = vst [vmem:[%s1239_s22 + $0x20] sm:$0xff] %v480_v3  ;;  %504 = vst [vmem:[%s1239_s22 + $0x60] sm:$0xff] %v488_v4  ;;  %vm459_vm0 = vcmp.ge.f32.partialorder %v441_v0, 0.0  ;;  %v475_v8 = vmul.f32 0.2, %v441_v0  ;;  %vm449_vm1 = vcmp.ge.f32.partialorder %v401_v5, 0.0 }
 0x15a   : > { %v465_v9 = vmul.f32 0.2, %v401_v5  ;;  %vm457_vm2 = vcmp.ge.f32.partialorder %v433_v6, 0.0  ;;  %v473_v10 = vmul.f32 0.2, %v433_v6  ;;  %v483_v11 = vsel %vm451_vm15, %v409_v63, %v467_v7 }
 0x15b   : > { %v491_v12 = vsel %vm459_vm0, %v441_v0, %v475_v8  ;;  %499 = vst [vmem:[%s1239_s22 + $0x38] sm:$0xff] %v483_v11 }
 0x15c   : > { %507 = vst [vmem:[%s1239_s22 + $0x78] sm:$0xff] %v491_v12  ;;  %v481_v13 = vsel %vm449_vm1, %v401_v5, %v465_v9  ;;  %v489_v14 = vsel %vm457_vm2, %v433_v6, %v473_v10 }
 0x15d   : > { %497 = vst [vmem:[%s1239_s22 + $0x28] sm:$0xff] %v481_v13  ;;  %505 = vst [vmem:[%s1239_s22 + $0x68] sm:$0xff] %v489_v14 }
 0x15e   : > { %901 = shalt.err (!%p898_p11)
}
 0x15f   : > { %s902_s30 = scalar_lea.hbm %s1268_s26, 2048  ;;  %s906_s7 = scalar_lea.hbm %s1326_s3, 4096 }
 0x160   : > { %p903_p0 = scmp.ne.s32.totalorder %s1268_s26, %s902_s30  ;;  %p907_p6 = scmp.lt.u32.totalorder %s1268_s26, %s1326_s3 }
 0x161   : > { %p908_p7 = scmp.lt.u32.totalorder %s906_s7, %s902_s30  ;;  %p910_p8 = scmp.lt.u32.totalorder %s902_s30, %s1268_s26 }
 0x162   : > { %p904_p4 = pnand %p903_p0, %p1341_p12 }
 0x163   : > { %p909_p2 = por %p908_p7, %p907_p6 }
 0x164   : > { %p905_p13 = pneg %p904_p4 }
 0x165   : > { %p911_p1 = por %p910_p8, %p909_p2 }
 0x167   : > { %p912_p10 = pnand %p911_p1, %p905_p13 }
 0x169   : > { %915 = shalt.err (!%p912_p10)
}
 0x16a   : > { %s983_s22 = smov 128   ;;  %s984_s24 = smov 8  }
 0x16b   : > { %714 = dma.vmem_to_hbm [thread:$0]  (%p1341_p12), %s1270_s11, 2048, %s1268_s26, %s509_s9, %s983_s22, %s983_s22, %s984_s24  }
 0x16c PF: > { %s539_s15 = sand.u32 1, %s954_s12   ;;  %p1342_p3 = scmp.ne.s32.totalorder %s1334_s23, 0 }
 0x16d   : > { %p1343_p5 = scmp.ge.s32.totalorder %s974_s17, 2  ;;  %s540_s18 = scalar_lea.sflag [#allocation4], %s539_s15 }
 0x16f   : > { %p728_p9 = pnand %p1343_p5, %p1342_p3 }
 0x171   : > { %949 = dma.done.wait (!%p728_p9), %s540_s18, 2048  }
 0x172   : > { %951 = vsyncadd (!%p728_p9), %s540_s18, 4294965248  ;;  %s20_s17 = sadd.s32 1, %s974_s17   ;;  %s1344_s12 = smov %s958_s13 }
 0x173   : > { %p17_p11 = scmp.ge.s32.totalorder %s20_s17, 4   ;;  %s1345_s13 = smov %s962_s14 }
 0x174   : > { %s1346_s14 = smov %s1151_s6  ;;  %s1347_s15 = smov %s970_s16 }
 0x175   : > { %s1348_s16 = smov %s1350_s25  ;;  %19 = sbr.rel (!%p17_p11) target bundleno = 7 (0x7), region = 85 }
 0x17c   :  { %545 = vsyncpa [#allocation3], 1 }
 0x17d   :  { %547 = vsyncpa [#allocation3 + $0x1], 1 }
 0x17e   :  { %548 = vsyncpa [#allocation6], 1 }
 0x17f   :  { %549 = vsyncpa [#allocation4], 1 }
 0x180   :  { %551 = vsyncpa [#allocation4 + $0x1], 1 }

// kernel: feature_matching_loss.8
= control target key start
LH: loop header
LB: loop body
LE: loop exit
PB: predicated region body
PF: predicated region fallthrough
CT: control target
= control target key end

     0   :  { %8 = vsyncpa [#allocation3], 0  ;;  %s1104_s0 = inlined_call_operand.hbm [shape: bf16[2,32,72], index: 0, kind: input, shape index: {}]   ;;  %s1105_s1 = inlined_call_operand.hbm [shape: bf16[72,128], index: 1, kind: input, shape index: {}]   ;;  %s1106_s2 = inlined_call_operand.hbm [shape: f32[1,128], index: 2, kind: input, shape index: {}]   ;;  %s1107_s3 = inlined_call_operand.hbm [shape: f32[2,32,128], index: 3, kind: output, shape index: {}]  }
   0x1   :  { %10 = vsyncpa [#allocation3 + $0x1], 0 }
   0x2   :  { %11 = vsyncpa [#allocation6], 0 }
   0x3   :  { %12 = vsyncpa [#allocation4], 0 }
   0x4   :  { %14 = vsyncpa [#allocation4 + $0x1], 0  ;;  %s841_s12 = smov 0   ;;  %s843_s13 = smov 0  }
   0x5   :  { %s845_s14 = smov 0   ;;  %s847_s15 = smov 0  }
   0x6   :  { %s849_s16 = smov 0   ;;  %s851_s17 = smov 0  }
   0x7 LB: > { %s492_s18 = sadd.s32 4294967295, %s811_s17   ;;  %s493_s19 = sadd.s32 4294967294, %s811_s17   ;;  %s811_s17 = sphi %s851_s17, %s20_s17   ;;  %s807_s16 = sphi %s849_s16, %s1129_s16   ;;  %s803_s15 = sphi %s847_s15, %s1128_s15   ;;  %s799_s14 = sphi %s845_s14, %s1127_s14   ;;  %s795_s13 = sphi %s843_s13, %s1126_s13   ;;  %s791_s12 = sphi %s841_s12, %s1125_s12  }
   0x8   : > { %p54_p0 = scmp.ne.s32.totalorder %s795_s13, %s791_s12  ;;  %p875_p1 = scmp.eq.s32.totalorder %s492_s18, 0 }
   0x9   : > { %p879_p2 = scmp.eq.s32.totalorder %s492_s18, 1  ;;  %p128_p3 = scmp.eq.s32.totalorder %s493_s19, 1 }
   0xa   : > { %s1112_s20 = scalar_select %p875_p1, 1, 0 }
   0xb   : > { %p885_p4 = por %p875_p1, %p54_p0  ;;  %p494_p5 = scmp.ge.s32.totalorder %s811_s17, 1 }
   0xc   : > { %p890_p6 = por %p128_p3, %p54_p0  ;;  %p135_p7 = scmp.lt.s32.totalorder %s811_s17, 3 }
   0xd   : > { %s1114_s22 = scalar_select %p885_p4, 1, 0 }
   0xe   : > { %s1115_s23 = scalar_select %p890_p6, 1, 0 }
   0xf   : > { %p895_p8 = pnand %p494_p5, %p135_p7  ;;  %s813_s25 = smov [#allocation5]  }
  0x10   : > { %s147_s26 = sshll.u32 %s813_s25, 4  ;;  %s814_s28 = smov [#allocation7]   ;;  %s899_s26 = int_to_ptr.vmem [resolvable:$true] %s147_s26 }
  0x11   : > { %p557_p9 = pneg %p895_p8  ;;  %s161_s29 = sshll.u32 %s814_s28, 4  ;;  %s910_s29 = int_to_ptr.vmem [resolvable:$true] %s161_s29 }
  0x12   : > { %s639_s5 = scalar_lea.hbm %s1105_s1, 576 }
  0x13   : > { %p906_p11 = pnand %p557_p9, %p875_p1  ;;  %p640_p12 = scmp.ne.s32.totalorder %s1105_s1, %s639_s5 }
  0x14   : > { %p646_p5 = scmp.lt.u32.totalorder %s639_s5, %s1105_s1 }
  0x15   : > { %p641_p13 = pneg %p906_p11 }
  0x17   : > { %p642_p0 = pnand %p641_p13, %p640_p12 }
  0x19   : > { %p643_p3 = pneg %p642_p0 }
  0x1b   : > { %p648_p7 = pnand %p646_p5, %p643_p3 }
  0x1d   : > { %651 = shalt.err (!%p648_p7)
}
  0x1e   : > { %s652_s10 = scalar_lea.vmem %s899_s26, 576  ;;  %p660_p1 = scmp.lt.s32.totalorder %s899_s26, %s899_s26 }
  0x1f   : > { %p653_p9 = scmp.ne.s32.totalorder %s899_s26, %s652_s10  ;;  %p661_p12 = scmp.lt.s32.totalorder %s652_s10, %s652_s10 }
  0x21   : > { %p655_p10 = pnand %p653_p9, %p641_p13  ;;  %p662_p0 = por %p661_p12, %p660_p1 }
  0x23   : > { %p656_p6 = pneg %p655_p10 }
  0x25   : > { %p663_p4 = pnand %p662_p0, %p656_p6 }
  0x27   : > { %666 = shalt.err (!%p663_p4)
}
  0x28   : > { %s815_s11 = smov 64   ;;  %s816_s18 = smov 4  }
  0x29   : > { %560 = dma.hbm_to_vmem [thread:$0]  (!%p906_p11), %s1105_s1, 576, %s899_s26, [#allocation6], %s815_s11, %s815_s11, %s816_s18  }
  0x2a   : > { %s667_s4 = scalar_lea.hbm %s1106_s2, 16 }
  0x2b   : > { %p668_p1 = scmp.ne.s32.totalorder %s1106_s2, %s667_s4  ;;  %p674_p10 = scmp.lt.u32.totalorder %s667_s4, %s1106_s2 }
  0x2d   : > { %p670_p4 = pnand %p668_p1, %p641_p13 }
  0x2f   : > { %p671_p6 = pneg %p670_p4 }
  0x31   : > { %p676_p3 = pnand %p674_p10, %p671_p6 }
  0x33   : > { %679 = shalt.err (!%p676_p3)
}
  0x34   : > { %s680_s26 = scalar_lea.vmem %s910_s29, 16  ;;  %s687_s9 = scalar_lea.vmem %s910_s29, 32 }
  0x35   : > { %p681_p5 = scmp.ne.s32.totalorder %s910_s29, %s680_s26  ;;  %p688_p12 = scmp.lt.s32.totalorder %s910_s29, %s910_s29 }
  0x36   : > { %p689_p0 = scmp.lt.s32.totalorder %s687_s9, %s680_s26 }
  0x37   : > { %p683_p7 = pnand %p681_p5, %p641_p13 }
  0x38   : > { %p690_p1 = por %p689_p0, %p688_p12 }
  0x39   : > { %p684_p9 = pneg %p683_p7 }
  0x3b   : > { %p691_p4 = pnand %p690_p1, %p684_p9 }
  0x3d   : > { %694 = shalt.err (!%p691_p4)
}
  0x3e   : > { %563 = dma.hbm_to_vmem [thread:$0]  (!%p906_p11), %s1106_s2, 16, %s910_s29, [#allocation6]  }
  0x3f   : > { %s32_s25 = sadd.s32 1, %s807_s16  ;;  %s41_s28 = sadd.s32 1, %s799_s14 }
  0x40   : > { %p34_p13 = scmp.ge.s32.totalorder %s32_s25, 2  ;;  %p48_p6 = scmp.ne.s32.totalorder %s799_s14, %s795_s13 }
  0x41   : > { %p49_p10 = scmp.eq.s32.totalorder %s811_s17, 0  ;;  %p574_p3 = scmp.lt.s32.totalorder %s811_s17, 2 }
  0x42   : > { %s1131_s25 = smov (%p34_p13, %s32_s25), 0  ;;  %p978_p7 = por %p879_p2, %p48_p6 }
  0x43   : > { %p50_p5 = por %p49_p10, %p48_p6  ;;  %s36_s30 = ssub.s32 %s807_s16, %s1131_s25 }
  0x44   : > { %s1118_s27 = scalar_select %p978_p7, 1, 0 }
  0x45   : > { %s172_s4 = sand.u32 1, %s799_s14   ;;  %p39_p9 = scmp.eq.s32.totalorder %s36_s30, 0 }
  0x46   : > { %s498_s29 = sshll.u32 %s172_s4, 4  ;;  %s521_s5 = sshll.u32 %s807_s16, 8 }
  0x47   : > { %s987_s6 = scalar_select %p39_p9, %s799_s14, %s41_s28  }
  0x48   : > { %s992_s26 = scalar_lea.hbm %s1104_s0, %s521_s5  ;;  %s176_s21 = scalar_lea.vmem [#allocation2], %s498_s29 }
  0x49   : > { %s185_s9 = sshll.u32 %s176_s21, 4  ;;  %p996_p2 = pnand %p574_p3, %p50_p5  ;;  %s1000_s9 = int_to_ptr.vmem [resolvable:$true] %s185_s9 }
  0x4a   : > { %s1002_s19 = scalar_lea.sflag [#allocation3], %s172_s4  ;;  %s695_s28 = scalar_lea.hbm %s992_s26, 256 }
  0x4b   : > { %p696_p11 = scmp.ne.s32.totalorder %s992_s26, %s695_s28  ;;  %p697_p12 = pneg %p996_p2 }
  0x4c   : > { %s700_s5 = scalar_lea.hbm %s1104_s0, 512  ;;  %p701_p4 = scmp.lt.u32.totalorder %s992_s26, %s1104_s0 }
  0x4d   : > { %p698_p0 = pnand %p697_p12, %p696_p11  ;;  %p702_p13 = scmp.lt.u32.totalorder %s700_s5, %s695_s28 }
  0x4e   : > { %p704_p10 = scmp.lt.u32.totalorder %s695_s28, %s992_s26 }
  0x4f   : > { %p699_p1 = pneg %p698_p0  ;;  %p703_p6 = por %p702_p13, %p701_p4 }
  0x51   : > { %p705_p3 = por %p704_p10, %p703_p6 }
  0x53   : > { %p706_p5 = pnand %p705_p3, %p699_p1 }
  0x55   : > { %709 = shalt.err (!%p706_p5)
}
  0x56   : > { %s710_s4 = scalar_lea.vmem %s1000_s9, 256  ;;  %s817_s21 = smov [#allocation2]  }
  0x57   : > { %p711_p9 = scmp.ne.s32.totalorder %s1000_s9, %s710_s4  ;;  %s715_s30 = sshll.u32 %s817_s21, 4  ;;  %s716_s30 = int_to_ptr.vmem [resolvable:$false] %s715_s30 }
  0x58   : > { %s717_s29 = scalar_lea.vmem %s716_s30, 512  ;;  %p718_p7 = scmp.lt.s32.totalorder %s1000_s9, %s716_s30 }
  0x59   : > { %p713_p11 = pnand %p711_p9, %p697_p12  ;;  %p719_p4 = scmp.lt.s32.totalorder %s717_s29, %s710_s4 }
  0x5b   : > { %p714_p0 = pneg %p713_p11  ;;  %p720_p13 = por %p719_p4, %p718_p7 }
  0x5d   : > { %p721_p6 = pnand %p720_p13, %p714_p0 }
  0x5f   : > { %724 = shalt.err (!%p721_p6)
}
  0x60   : > { %567 = dma.hbm_to_vmem [thread:$0]  (!%p996_p2), %s992_s26, 256, %s1000_s9, %s1002_s19, %s815_s11, %s815_s11, %s816_s18  }
  0x61   : > { %197 = sbr.rel (%p895_p8) target bundleno = 364 (0x16c), region = 32  ;;  %s1036_s28 = sand.u32 (!%p895_p8), 1, %s795_s13  }
  0x62   : > { %s502_s5 = sshll.u32 (!%p895_p8), %s1036_s28, 4  ;;  %s200_s7 = scalar_lea.sflag (!%p895_p8), [#allocation3], %s1036_s28 }
  0x63   : > { %s203_s8 = scalar_lea.vmem (!%p895_p8), [#allocation2], %s502_s5  ;;  %p1120_p7 = scmp.ne.s32.totalorder (!%p895_p8), %s1114_s22, 0 }
  0x68   : > { %778 = dma.done.wait (%p1120_p7), %s200_s7, 256  }
  0x69   : > { %780 = vsyncadd (%p1120_p7), %s200_s7, 4294967040  ;;  %p1121_p12 = scmp.ne.s32.totalorder %s1112_s20, 0 }
  0x6b   : > { %782 = dma.done.wait (%p1121_p12), [#allocation6], 592  }
  0x6c   : > { %784 = vsyncadd (%p1121_p12), [#allocation6], 4294966704  ;;  %v632_v0 = vld [vmem:[#allocation5] sm:$0xff]   ;;  %v633_v1 = vld [vmem:[#allocation5 + $0x8] sm:$0xff]   ;;  %vm294_vm0 = vcmask 588800   ;;  %vm301_vm1 = vcmask 1043456  }
  0x6d   : > { %530 = vmatprep.subr.bf16.mxu0 %v632_v0  ;;  %v634_v2 = vld [vmem:[#allocation5 + $0x10] sm:$0xff]   ;;  %v635_v4 = vld [vmem:[#allocation5 + $0x18] sm:$0xff]   ;;  %v636_v5 = vld [vmem:[#allocation5 + $0x20] ss:$0 sps:$4 sm:$0xff]   ;;  %s505_s20 = sshll.u32 %s1036_s28, 5  ;;  %s522_s11 = sshll.u32 %s803_s15, 9 }
  0x6e   : > { %531 = vmatpush3.bf16.msra.mxu0 %v632_v0  ;;  %v637_v3 = vld [vmem:[%s203_s8] sm:$0xff]   ;;  %v303_v6 = vsel %vm301_vm1, %v636_v5, 0  ;;  %v638_v7 = vld [vmem:[%s203_s8 + $0x8] sm:$0xff]   ;;  %s233_s22 = scalar_lea.vmem [#allocation8], %s505_s20  ;;  %s1055_s15 = scalar_lea.hbm %s1107_s3, %s522_s11 }
  0x6f   : > { %532 = vmatprep.subr.bf16.mxu0 %v633_v1  ;;  %540 = vmatprep.mubr.msk.bf16.mxu0 %vm294_vm0, %v637_v3  ;;  %v506_v8 = vld [vmem:[#allocation7] ss:$0 sm:$0xff]  ;;  %s386_s24 = sshll.u32 %s233_s22, 4  ;;  %s371_s9 = scalar_lea.sflag [#allocation4], %s1036_s28  ;;  %s1050_s24 = int_to_ptr.vmem [resolvable:$true] %s386_s24 }
  0x70   : > { %s725_s10 = scalar_lea.vmem %s1050_s24, 512  ;;  %p1122_p2 = scmp.ne.s32.totalorder %s1118_s27, 0 }
  0x71   : > { %p726_p8 = scmp.ne.s32.totalorder %s1050_s24, %s725_s10  ;;  %s818_s19 = smov [#allocation8]  }
  0x72   : > { %533 = vmatpush3.bf16.msra.mxu0 %v633_v1  ;;  %s729_s4 = sshll.u32 %s818_s19, 4  ;;  %s730_s4 = int_to_ptr.vmem [resolvable:$false] %s729_s4 }
  0x73   : > { %534 = vmatprep.subr.bf16.mxu0 %v634_v2  ;;  %p727_p1 = pnand %p726_p8, %p1122_p2  ;;  %s731_s21 = scalar_lea.vmem %s730_s4, 1024 }
  0x74   : > { %p732_p3 = scmp.lt.s32.totalorder %s1050_s24, %s730_s4  ;;  %p733_p5 = scmp.lt.s32.totalorder %s731_s21, %s725_s10 }
  0x75   : > { %p728_p10 = pneg %p727_p1 }
  0x76   : > { %535 = vmatpush3.bf16.msra.mxu0 %v634_v2  ;;  %p734_p9 = por %p733_p5, %p732_p3 }
  0x77   : > { %536 = vmatprep.subr.bf16.mxu0 %v635_v4 }
  0x78   : > { %p735_p11 = pnand %p734_p9, %p728_p10 }
  0x7a   : > { %537 = vmatpush3.bf16.msra.mxu0 %v635_v4 }
  0x7b   : > { %544 = vmatprep.subr.msk.bf16.mxu0 %vm301_vm1, %v636_v5 }
  0x7e   : > { %539 = vmatpush3.bf16.msra.mxu0 %v303_v6 }
  0x81   : > { %541 = vmatmul.mubr.msk.bf16.vlgmr.msra.gmra.mrb[0].mxu0 %vm294_vm0, %v638_v7 }
 0x154   : > { %v542_v9 = vpop.f32.mrb[0].mxu0 }
 0x155   : > { %v348_v10 = vadd.f32 %v542_v9, %v506_v8  ;;  %v339_v11 = vpop.f32.mrb[1].mxu0 }
 0x156   : > { %v340_v12 = vadd.f32 %v506_v8, %v339_v11  ;;  %v543_v13 = vpop.f32.mrb[2].mxu0 }
 0x157   : > { %vm356_vm2 = vcmp.ge.f32.partialorder %v348_v10, 0.0  ;;  %v360_v14 = vmul.f32 0.2, %v348_v10  ;;  %v351_v15 = vadd.f32 %v543_v13, %v506_v8  ;;  %v342_v16 = vpop.f32.mrb[3].mxu0 }
 0x158   : > { %vm354_vm3 = vcmp.ge.f32.partialorder %v340_v12, 0.0  ;;  %v358_v17 = vmul.f32 0.2, %v340_v12  ;;  %v343_v18 = vadd.f32 %v506_v8, %v342_v16 }
 0x159   : > { %v364_v19 = vsel %vm356_vm2, %v348_v10, %v360_v14  ;;  %vm357_vm4 = vcmp.ge.f32.partialorder %v351_v15, 0.0  ;;  %v361_v20 = vmul.f32 0.2, %v351_v15 }
 0x15a   : > { %368 = vst [vmem:[%s233_s22 + $0x10] sm:$0xff] %v364_v19  ;;  %v362_v21 = vsel %vm354_vm3, %v340_v12, %v358_v17  ;;  %vm355_vm5 = vcmp.ge.f32.partialorder %v343_v18, 0.0  ;;  %v359_v22 = vmul.f32 0.2, %v343_v18 }
 0x15b   : > { %366 = vst [vmem:[%s233_s22] sm:$0xff] %v362_v21  ;;  %v365_v23 = vsel %vm357_vm4, %v351_v15, %v361_v20 }
 0x15c   : > { %369 = vst [vmem:[%s233_s22 + $0x18] sm:$0xff] %v365_v23  ;;  %v363_v24 = vsel %vm355_vm5, %v343_v18, %v359_v22 }
 0x15d   : > { %367 = vst [vmem:[%s233_s22 + $0x8] sm:$0xff] %v363_v24 }
 0x15e   : > { %738 = shalt.err (!%p735_p11)
}
 0x15f   : > { %s739_s30 = scalar_lea.hbm %s1055_s15, 512  ;;  %s743_s7 = scalar_lea.hbm %s1107_s3, 1024 }
 0x160   : > { %p740_p0 = scmp.ne.s32.totalorder %s1055_s15, %s739_s30  ;;  %p744_p6 = scmp.lt.u32.totalorder %s1055_s15, %s1107_s3 }
 0x161   : > { %p745_p7 = scmp.lt.u32.totalorder %s743_s7, %s739_s30  ;;  %p747_p8 = scmp.lt.u32.totalorder %s739_s30, %s1055_s15 }
 0x162   : > { %p741_p4 = pnand %p740_p0, %p1122_p2 }
 0x163   : > { %p746_p12 = por %p745_p7, %p744_p6 }
 0x164   : > { %p742_p13 = pneg %p741_p4 }
 0x165   : > { %p748_p1 = por %p747_p8, %p746_p12 }
 0x167   : > { %p749_p10 = pnand %p748_p1, %p742_p13 }
 0x169   : > { %752 = shalt.err (!%p749_p10)
}
 0x16a   : > { %s819_s22 = smov 128   ;;  %s820_s11 = smov 8  }
 0x16b   : > { %555 = dma.vmem_to_hbm [thread:$0]  (%p1122_p2), %s1050_s24, 512, %s1055_s15, %s371_s9, %s819_s22, %s819_s22, %s820_s11  }
 0x16c PF: > { %s401_s18 = sand.u32 1, %s791_s12   ;;  %p1123_p3 = scmp.ne.s32.totalorder %s1115_s23, 0 }
 0x16d   : > { %p1124_p5 = scmp.ge.s32.totalorder %s811_s17, 2  ;;  %s402_s26 = scalar_lea.sflag [#allocation4], %s401_s18 }
 0x16f   : > { %p569_p9 = pnand %p1124_p5, %p1123_p3 }
 0x171   : > { %786 = dma.done.wait (!%p569_p9), %s402_s26, 512  }
 0x172   : > { %788 = vsyncadd (!%p569_p9), %s402_s26, 4294966784  ;;  %s20_s17 = sadd.s32 1, %s811_s17   ;;  %s1125_s12 = smov %s795_s13 }
 0x173   : > { %p17_p11 = scmp.ge.s32.totalorder %s20_s17, 4   ;;  %s1126_s13 = smov %s799_s14 }
 0x174   : > { %s1127_s14 = smov %s987_s6  ;;  %s1128_s15 = smov %s807_s16 }
 0x175   : > { %s1129_s16 = smov %s1131_s25  ;;  %19 = sbr.rel (!%p17_p11) target bundleno = 7 (0x7), region = 85 }
 0x17c   :  { %407 = vsyncpa [#allocation3], 1 }
 0x17d   :  { %409 = vsyncpa [#allocation3 + $0x1], 1 }
 0x17e   :  { %410 = vsyncpa [#allocation6], 1 }
 0x17f   :  { %411 = vsyncpa [#allocation4], 1 }
 0x180   :  { %413 = vsyncpa [#allocation4 + $0x1], 1 }

// kernel: feature_matching_loss.11
= control target key start
LH: loop header
LB: loop body
LE: loop exit
PB: predicated region body
PF: predicated region fallthrough
CT: control target
= control target key end

     0   :  { %7 = vsyncpa [#allocation3], 0  ;;  %s219_s0 = inlined_call_operand.hbm [shape: f32[2,8,128], index: 0, kind: input, shape index: {}]   ;;  %s220_s1 = inlined_call_operand.hbm [shape: f32[8,1], index: 1, kind: input, shape index: {}]   ;;  %s221_s2 = inlined_call_operand.hbm [shape: f32[1,8,128], index: 2, kind: output, shape index: {}]  }
   0x1   :  { %8 = vsyncpa [#allocation6], 0 }
   0x2   :  { %9 = vsyncpa [#allocation4], 0  ;;  %s162_s9 = smov [#allocation2]   ;;  %s90_s13 = scalar_lea.hbm %s219_s0, 256 }
   0x3   :  { %s18_s10 = sshll.u32 %s162_s9, 4  ;;  %p91_p0 = scmp.ne.s32.totalorder %s219_s0, %s90_s13  ;;  %s19_s10 = int_to_ptr.vmem [resolvable:$true] %s18_s10 }
   0x4   :  { %p94_p1 = scmp.lt.u32.totalorder %s90_s13, %s219_s0 }
   0x6   :  { %p96_p2 = pnand %p94_p1, %p91_p0 }
   0x8   :  { %99 = shalt.err (!%p96_p2)
}
   0x9   :  { %s100_s18 = scalar_lea.vmem %s19_s10, 256  ;;  %p105_p4 = scmp.lt.s32.totalorder %s19_s10, %s19_s10 }
   0xa   :  { %p101_p3 = scmp.ne.s32.totalorder %s19_s10, %s100_s18  ;;  %p106_p5 = scmp.lt.s32.totalorder %s100_s18, %s100_s18 }
   0xc   :  { %p107_p6 = por %p106_p5, %p105_p4 }
   0xe   :  { %p108_p7 = pnand %p107_p6, %p101_p3 }
  0x10   :  { %111 = shalt.err (!%p108_p7)
}
  0x11   :  { %s163_s19 = smov 128   ;;  %s164_s20 = smov 8  }
  0x12   :  { %24 = dma.hbm_to_vmem [thread:$0]  %s219_s0, 256, %s19_s10, [#allocation3], %s163_s19, %s163_s19, %s164_s20  }
  0x13   :  { %s165_s23 = smov [#allocation5]   ;;  %s112_s27 = scalar_lea.hbm %s220_s1, 128 }
  0x14   :  { %s34_s24 = sshll.u32 %s165_s23, 4  ;;  %p113_p8 = scmp.ne.s32.totalorder %s220_s1, %s112_s27  ;;  %s35_s24 = int_to_ptr.vmem [resolvable:$true] %s34_s24 }
  0x15   :  { %p116_p9 = scmp.lt.u32.totalorder %s112_s27, %s220_s1 }
  0x17   :  { %p118_p10 = pnand %p116_p9, %p113_p8 }
  0x19   :  { %121 = shalt.err (!%p118_p10)
}
  0x1a   :  { %s122_s4 = scalar_lea.vmem %s35_s24, 128  ;;  %p127_p12 = scmp.lt.s32.totalorder %s35_s24, %s35_s24 }
  0x1b   :  { %p123_p11 = scmp.ne.s32.totalorder %s35_s24, %s122_s4  ;;  %p128_p13 = scmp.lt.s32.totalorder %s122_s4, %s122_s4 }
  0x1d   :  { %p129_p0 = por %p128_p13, %p127_p12 }
  0x1f   :  { %p130_p1 = pnand %p129_p0, %p123_p11 }
  0x21   :  { %133 = shalt.err (!%p130_p1)
}
  0x22   :  { %37 = dma.hbm_to_vmem [thread:$0]  %s220_s1, 128, %s35_s24, [#allocation6]  }
  0x23   :  { %156 = dma.done.wait [#allocation3], 256  }
  0x24   :  { %157 = vsyncadd [#allocation3], 4294967040 }
  0x25   :  { %158 = dma.done.wait [#allocation6], 128  }
  0x26   :  { %159 = vsyncadd [#allocation6], 4294967168  ;;  %v166_v0 = vmov 0   ;;  %v57_v1 = vld [vmem:[#allocation5] sm:$0xff]  ;;  %v51_v2 = vld [vmem:[#allocation2] sm:$0xff]  ;;  %s167_s6 = smov [#allocation7]  }
  0x27   :  { %89 = vset.pattern.permute.xlu0 %v166_v0  ;;  %v53_v3 = vld [vmem:[#allocation2 + $0x8] sm:$0xff]  ;;  %s72_s7 = sshll.u32 %s167_s6, 4  ;;  %s73_s7 = int_to_ptr.vmem [resolvable:$true] %s72_s7 }
  0x28   :  { %60 = vperm.xlu0 %89, %v57_v1   ;;  %v54_v4 = vsub.f32 %v51_v2, %v53_v3  ;;  %s134_s8 = scalar_lea.vmem %s73_s7, 128  ;;  %p139_p3 = scmp.lt.s32.totalorder %s73_s7, %s73_s7 }
  0x29   :  { %p135_p2 = scmp.ne.s32.totalorder %s73_s7, %s134_s8  ;;  %p140_p4 = scmp.lt.s32.totalorder %s134_s8, %s134_s8 }
  0x2a   :  { %v56_v5 = vmul.f32 %v54_v4, %v54_v4 }
  0x2b   :  { %p141_p5 = por %p140_p4, %p139_p3 }
  0x2d   :  { %p142_p6 = pnand %p141_p5, %p135_p2 }
  0xa7   :  { %v61_v6 = vpop.permute.xlu0 %60 }
  0xa8   :  { %v63_v7 = vmul.f32 %v61_v6, %v56_v5 }
  0xaa   :  { %65 = vst [vmem:[#allocation7] sm:$0xff] %v63_v7 }
  0xab   :  { %145 = shalt.err (!%p142_p6)
}
  0xac   :  { %s146_s10 = scalar_lea.hbm %s221_s2, 128 }
  0xad   :  { %p147_p7 = scmp.ne.s32.totalorder %s221_s2, %s146_s10  ;;  %p150_p8 = scmp.lt.u32.totalorder %s146_s10, %s221_s2 }
  0xaf   :  { %p152_p9 = pnand %p150_p8, %p147_p7 }
  0xb1   :  { %155 = shalt.err (!%p152_p9)
}
  0xb2   :  { %75 = dma.vmem_to_hbm [thread:$0]  %s73_s7, 128, %s221_s2, [#allocation4]  }
  0xb3   :  { %160 = dma.done.wait [#allocation4], 128  }
  0xb4   :  { %161 = vsyncadd [#allocation4], 4294967168 }
  0xb5   :  { %79 = vsyncpa [#allocation3], 1 }
  0xb6   :  { %80 = vsyncpa [#allocation6], 1 }
  0xb7   :  { %81 = vsyncpa [#allocation4], 1 }

// kernel: feature_matching_loss.10
= control target key start
LH: loop header
LB: loop body
LE: loop exit
PB: predicated region body
PF: predicated region fallthrough
CT: control target
= control target key end

     0   :  { %8 = vsyncpa [#allocation3], 0  ;;  %s1068_s0 = inlined_call_operand.hbm [shape: bf16[2,8,144], index: 0, kind: input, shape index: {}]   ;;  %s1069_s1 = inlined_call_operand.hbm [shape: bf16[144,128], index: 1, kind: input, shape index: {}]   ;;  %s1070_s2 = inlined_call_operand.hbm [shape: f32[1,128], index: 2, kind: input, shape index: {}]   ;;  %s1071_s3 = inlined_call_operand.hbm [shape: f32[2,8,128], index: 3, kind: output, shape index: {}]  }
   0x1   :  { %10 = vsyncpa [#allocation3 + $0x1], 0 }
   0x2   :  { %11 = vsyncpa [#allocation6], 0 }
   0x3   :  { %12 = vsyncpa [#allocation4], 0 }
   0x4   :  { %14 = vsyncpa [#allocation4 + $0x1], 0  ;;  %s813_s12 = smov 0   ;;  %s815_s13 = smov 0  }
   0x5   :  { %s817_s14 = smov 0   ;;  %s819_s15 = smov 0  }
   0x6   :  { %s821_s16 = smov 0   ;;  %s823_s17 = smov 0  }
   0x7 LB: > { %s483_s18 = sadd.s32 4294967295, %s784_s17   ;;  %s484_s19 = sadd.s32 4294967294, %s784_s17   ;;  %s784_s17 = sphi %s823_s17, %s20_s17   ;;  %s780_s16 = sphi %s821_s16, %s1093_s16   ;;  %s776_s15 = sphi %s819_s15, %s1092_s15   ;;  %s772_s14 = sphi %s817_s14, %s1091_s14   ;;  %s768_s13 = sphi %s815_s13, %s1090_s13   ;;  %s764_s12 = sphi %s813_s12, %s1089_s12  }
   0x8   : > { %p54_p0 = scmp.ne.s32.totalorder %s768_s13, %s764_s12  ;;  %p847_p1 = scmp.eq.s32.totalorder %s483_s18, 0 }
   0x9   : > { %p851_p2 = scmp.eq.s32.totalorder %s483_s18, 1  ;;  %p128_p3 = scmp.eq.s32.totalorder %s484_s19, 1 }
   0xa   : > { %s1076_s20 = scalar_select %p847_p1, 1, 0 }
   0xb   : > { %p857_p4 = por %p847_p1, %p54_p0  ;;  %p485_p5 = scmp.ge.s32.totalorder %s784_s17, 1 }
   0xc   : > { %p862_p6 = por %p128_p3, %p54_p0  ;;  %p135_p7 = scmp.lt.s32.totalorder %s784_s17, 3 }
   0xd   : > { %s1078_s22 = scalar_select %p857_p4, 1, 0 }
   0xe   : > { %s1079_s23 = scalar_select %p862_p6, 1, 0 }
   0xf   : > { %p867_p8 = pnand %p485_p5, %p135_p7  ;;  %s786_s25 = smov [#allocation5]  }
  0x10   : > { %s147_s26 = sshll.u32 %s786_s25, 4  ;;  %s787_s28 = smov [#allocation7]   ;;  %s871_s26 = int_to_ptr.vmem [resolvable:$true] %s147_s26 }
  0x11   : > { %p527_p9 = pneg %p867_p8  ;;  %s161_s29 = sshll.u32 %s787_s28, 4  ;;  %s882_s29 = int_to_ptr.vmem [resolvable:$true] %s161_s29 }
  0x12   : > { %s612_s5 = scalar_lea.hbm %s1069_s1, 1152 }
  0x13   : > { %p878_p11 = pnand %p527_p9, %p847_p1  ;;  %p613_p12 = scmp.ne.s32.totalorder %s1069_s1, %s612_s5 }
  0x14   : > { %p619_p5 = scmp.lt.u32.totalorder %s612_s5, %s1069_s1 }
  0x15   : > { %p614_p13 = pneg %p878_p11 }
  0x17   : > { %p615_p0 = pnand %p614_p13, %p613_p12 }
  0x19   : > { %p616_p3 = pneg %p615_p0 }
  0x1b   : > { %p621_p7 = pnand %p619_p5, %p616_p3 }
  0x1d   : > { %624 = shalt.err (!%p621_p7)
}
  0x1e   : > { %s625_s10 = scalar_lea.vmem %s871_s26, 1152  ;;  %p633_p1 = scmp.lt.s32.totalorder %s871_s26, %s871_s26 }
  0x1f   : > { %p626_p9 = scmp.ne.s32.totalorder %s871_s26, %s625_s10  ;;  %p634_p12 = scmp.lt.s32.totalorder %s625_s10, %s625_s10 }
  0x21   : > { %p628_p10 = pnand %p626_p9, %p614_p13  ;;  %p635_p0 = por %p634_p12, %p633_p1 }
  0x23   : > { %p629_p6 = pneg %p628_p10 }
  0x25   : > { %p636_p4 = pnand %p635_p0, %p629_p6 }
  0x27   : > { %639 = shalt.err (!%p636_p4)
}
  0x28   : > { %s788_s11 = smov 64   ;;  %s789_s18 = smov 4  }
  0x29   : > { %530 = dma.hbm_to_vmem [thread:$0]  (!%p878_p11), %s1069_s1, 1152, %s871_s26, [#allocation6], %s788_s11, %s788_s11, %s789_s18  }
  0x2a   : > { %s640_s4 = scalar_lea.hbm %s1070_s2, 16 }
  0x2b   : > { %p641_p1 = scmp.ne.s32.totalorder %s1070_s2, %s640_s4  ;;  %p647_p10 = scmp.lt.u32.totalorder %s640_s4, %s1070_s2 }
  0x2d   : > { %p643_p4 = pnand %p641_p1, %p614_p13 }
  0x2f   : > { %p644_p6 = pneg %p643_p4 }
  0x31   : > { %p649_p3 = pnand %p647_p10, %p644_p6 }
  0x33   : > { %652 = shalt.err (!%p649_p3)
}
  0x34   : > { %s653_s26 = scalar_lea.vmem %s882_s29, 16  ;;  %s660_s9 = scalar_lea.vmem %s882_s29, 32 }
  0x35   : > { %p654_p5 = scmp.ne.s32.totalorder %s882_s29, %s653_s26  ;;  %p661_p12 = scmp.lt.s32.totalorder %s882_s29, %s882_s29 }
  0x36   : > { %p662_p0 = scmp.lt.s32.totalorder %s660_s9, %s653_s26 }
  0x37   : > { %p656_p7 = pnand %p654_p5, %p614_p13 }
  0x38   : > { %p663_p1 = por %p662_p0, %p661_p12 }
  0x39   : > { %p657_p9 = pneg %p656_p7 }
  0x3b   : > { %p664_p4 = pnand %p663_p1, %p657_p9 }
  0x3d   : > { %667 = shalt.err (!%p664_p4)
}
  0x3e   : > { %533 = dma.hbm_to_vmem [thread:$0]  (!%p878_p11), %s1070_s2, 16, %s882_s29, [#allocation6]  }
  0x3f   : > { %s32_s18 = sadd.s32 1, %s780_s16  ;;  %s41_s19 = sadd.s32 1, %s772_s14 }
  0x40   : > { %p34_p13 = scmp.ge.s32.totalorder %s32_s18, 2  ;;  %p48_p6 = scmp.ne.s32.totalorder %s772_s14, %s768_s13 }
  0x41   : > { %p49_p10 = scmp.eq.s32.totalorder %s784_s17, 0  ;;  %p544_p3 = scmp.lt.s32.totalorder %s784_s17, 2 }
  0x42   : > { %s1095_s18 = smov (%p34_p13, %s32_s18), 0  ;;  %p947_p7 = por %p851_p2, %p48_p6 }
  0x43   : > { %p50_p5 = por %p49_p10, %p48_p6  ;;  %s36_s25 = ssub.s32 %s780_s16, %s1095_s18 }
  0x44   : > { %s1082_s27 = scalar_select %p947_p7, 1, 0 }
  0x45   : > { %s172_s28 = sand.u32 1, %s772_s14   ;;  %p39_p9 = scmp.eq.s32.totalorder %s36_s25, 0 }
  0x46   : > { %s489_s29 = sshll.u32 %s172_s28, 3  ;;  %s514_s30 = sshll.u32 %s780_s16, 7 }
  0x47   : > { %s956_s4 = scalar_select %p39_p9, %s772_s14, %s41_s19  }
  0x48   : > { %s961_s7 = scalar_lea.hbm %s1068_s0, %s514_s30  ;;  %s176_s21 = scalar_lea.vmem [#allocation2], %s489_s29 }
  0x49   : > { %s186_s8 = sshll.u32 %s176_s21, 4  ;;  %p965_p2 = pnand %p544_p3, %p50_p5  ;;  %s969_s8 = int_to_ptr.vmem [resolvable:$true] %s186_s8 }
  0x4a   : > { %s173_s9 = scalar_lea.sflag [#allocation3], %s172_s28  ;;  %s668_s10 = scalar_lea.hbm %s961_s7, 128 }
  0x4b   : > { %p669_p11 = scmp.ne.s32.totalorder %s961_s7, %s668_s10  ;;  %p670_p12 = pneg %p965_p2 }
  0x4c   : > { %s673_s25 = scalar_lea.hbm %s1068_s0, 256  ;;  %p674_p4 = scmp.lt.u32.totalorder %s961_s7, %s1068_s0 }
  0x4d   : > { %p671_p0 = pnand %p670_p12, %p669_p11  ;;  %p675_p13 = scmp.lt.u32.totalorder %s673_s25, %s668_s10 }
  0x4e   : > { %p677_p10 = scmp.lt.u32.totalorder %s668_s10, %s961_s7 }
  0x4f   : > { %p672_p1 = pneg %p671_p0  ;;  %p676_p6 = por %p675_p13, %p674_p4 }
  0x51   : > { %p678_p3 = por %p677_p10, %p676_p6 }
  0x53   : > { %p679_p5 = pnand %p678_p3, %p672_p1 }
  0x55   : > { %682 = shalt.err (!%p679_p5)
}
  0x56   : > { %s683_s28 = scalar_lea.vmem %s969_s8, 128  ;;  %s790_s5 = smov [#allocation2]  }
  0x57   : > { %p684_p9 = scmp.ne.s32.totalorder %s969_s8, %s683_s28  ;;  %s688_s6 = sshll.u32 %s790_s5, 4  ;;  %s689_s6 = int_to_ptr.vmem [resolvable:$false] %s688_s6 }
  0x58   : > { %s690_s21 = scalar_lea.vmem %s689_s6, 256  ;;  %p691_p7 = scmp.lt.s32.totalorder %s969_s8, %s689_s6 }
  0x59   : > { %p686_p11 = pnand %p684_p9, %p670_p12  ;;  %p692_p4 = scmp.lt.s32.totalorder %s690_s21, %s683_s28 }
  0x5b   : > { %p687_p0 = pneg %p686_p11  ;;  %p693_p13 = por %p692_p4, %p691_p7 }
  0x5d   : > { %p694_p6 = pnand %p693_p13, %p687_p0 }
  0x5f   : > { %697 = shalt.err (!%p694_p6)
}
  0x60   : > { %537 = dma.hbm_to_vmem [thread:$0]  (!%p965_p2), %s961_s7, 128, %s969_s8, %s173_s9  }
  0x61   : > { %195 = sbr.rel (%p867_p8) target bundleno = 376 (0x178), region = 32  ;;  %s999_s10 = sand.u32 (!%p867_p8), 1, %s768_s13  }
  0x62   : > { %s493_s11 = sshll.u32 (!%p867_p8), %s999_s10, 3  ;;  %s198_s19 = scalar_lea.sflag (!%p867_p8), [#allocation3], %s999_s10 }
  0x63   : > { %s201_s25 = scalar_lea.vmem (!%p867_p8), [#allocation2], %s493_s11  ;;  %p1084_p7 = scmp.ne.s32.totalorder (!%p867_p8), %s1078_s22, 0 }
  0x68   : > { %751 = dma.done.wait (%p1084_p7), %s198_s19, 128  }
  0x69   : > { %753 = vsyncadd (%p1084_p7), %s198_s19, 4294967168  ;;  %p1085_p2 = scmp.ne.s32.totalorder %s1076_s20, 0 }
  0x6b   : > { %755 = dma.done.wait (%p1085_p2), [#allocation6], 1168  }
  0x6c   : > { %757 = vsyncadd (%p1085_p2), [#allocation6], 4294966128  ;;  %v791_v0 = vmov 0   ;;  %v601_v1 = vld [vmem:[#allocation5] sm:$0xff]   ;;  %v602_v2 = vld [vmem:[#allocation5 + $0x8] sm:$0xff]   ;;  %vm319_vm0 = vcmask 130048  }
  0x6d   : > { %323 = vmatprep.subr.bf16.mxu0 %v791_v0  ;;  %v603_v3 = vld [vmem:[#allocation5 + $0x10] sm:$0xff]   ;;  %v604_v5 = vld [vmem:[#allocation5 + $0x18] sm:$0xff]   ;;  %v605_v7 = vld [vmem:[#allocation5 + $0x20] sm:$0xff]   ;;  %s511_s20 = sshll.u32 %s776_s15, 7  ;;  %s231_s22 = scalar_lea.vmem [#allocation8], %s493_s11 }
  0x6e   : > { %324 = vmatpush1.bf16.msra.mxu0 %v601_v1  ;;  %v233_v4 = vld [vmem:[%s201_s25] sm:$0xff]  ;;  %v606_v8 = vld [vmem:[#allocation5 + $0x28] sm:$0xff]   ;;  %v609_v11 = vld [vmem:[#allocation5 + $0x40] sm:$0xff]   ;;  %s382_s24 = sshll.u32 %s231_s22, 4  ;;  %s1019_s26 = scalar_lea.hbm %s1071_s3, %s511_s20  ;;  %s1021_s24 = int_to_ptr.vmem [resolvable:$true] %s382_s24 }
  0x6f   : > { %325 = vmatprep.subr.bf16.mxu0 %v791_v0  ;;  %v499_v6 = vcombine.high %v233_v4, %v233_v4  ;;  %v607_v9 = vld [vmem:[#allocation5 + $0x30] sm:$0xff]   ;;  %v608_v10 = vld [vmem:[#allocation5 + $0x38] sm:$0xff]   ;;  %v498_v12 = vcombine.low %v233_v4, %v233_v4  ;;  %v497_v13 = vld [vmem:[#allocation7] ss:$0 sm:$0xff]  ;;  %s368_s15 = scalar_lea.sflag [#allocation4], %s999_s10  ;;  %s698_s9 = scalar_lea.vmem %s1021_s24, 128 }
  0x70   : > { %p699_p8 = scmp.ne.s32.totalorder %s1021_s24, %s698_s9  ;;  %p1086_p12 = scmp.ne.s32.totalorder %s1082_s27, 0 }
  0x71   : > { %509 = vmatprep.mubr.msk.bf16.mxu0 %vm319_vm0, %v499_v6  ;;  %s792_s29 = smov [#allocation8]  }
  0x72   : > { %326 = vmatpush1.bf16.msra.mxu0 %v602_v2  ;;  %p700_p1 = pnand %p699_p8, %p1086_p12  ;;  %s702_s30 = sshll.u32 %s792_s29, 4  ;;  %s703_s30 = int_to_ptr.vmem [resolvable:$false] %s702_s30 }
  0x73   : > { %327 = vmatprep.subr.bf16.mxu0 %v791_v0  ;;  %s704_s28 = scalar_lea.vmem %s703_s30, 256  ;;  %p705_p3 = scmp.lt.s32.totalorder %s1021_s24, %s703_s30 }
  0x74   : > { %p701_p10 = pneg %p700_p1  ;;  %p706_p5 = scmp.lt.s32.totalorder %s704_s28, %s698_s9 }
  0x76   : > { %328 = vmatpush1.bf16.msra.mxu0 %v603_v3  ;;  %p707_p9 = por %p706_p5, %p705_p3 }
  0x77   : > { %329 = vmatprep.subr.bf16.mxu0 %v791_v0 }
  0x78   : > { %p708_p11 = pnand %p707_p9, %p701_p10 }
  0x7a   : > { %330 = vmatpush1.bf16.msra.mxu0 %v604_v5 }
  0x7b   : > { %331 = vmatprep.subr.bf16.mxu0 %v791_v0 }
  0x7e   : > { %332 = vmatpush1.bf16.msra.mxu0 %v605_v7 }
  0x7f   : > { %333 = vmatprep.subr.bf16.mxu0 %v791_v0 }
  0x82   : > { %334 = vmatpush1.bf16.msra.mxu0 %v606_v8 }
  0x83   : > { %335 = vmatprep.subr.bf16.mxu0 %v791_v0 }
  0x86   : > { %336 = vmatpush1.bf16.msra.mxu0 %v607_v9 }
  0x87   : > { %337 = vmatprep.subr.bf16.mxu0 %v791_v0 }
  0x8a   : > { %338 = vmatpush1.bf16.msra.mxu0 %v608_v10 }
  0x8b   : > { %339 = vmatprep.subr.bf16.mxu0 %v791_v0 }
  0x8e   : > { %340 = vmatpush1.bf16.msra.mxu0 %v609_v11 }
  0x91   : > { %356 = vmatmul.mubr.bf16.vlgmr.msra.gmra.mrb[0].mxu0 %v498_v12 }
 0x164   : > { %v357_v14 = vpop.f32.mrb[0].mxu0 }
 0x165   : > { %v358_v15 = vadd.f32 %v497_v13, %v357_v14  ;;  %v359_v16 = vpop.f32.mrb[1].mxu0 }
 0x166   : > { %v360_v17 = vpop.f32.mrb[2].mxu0 }
 0x167   : > { %vm363_vm1 = vcmp.ge.f32.partialorder %v358_v15, 0.0  ;;  %v364_v18 = vmul.f32 0.2, %v358_v15  ;;  %v361_v19 = vpop.f32.mrb[3].mxu0 }
 0x169   : > { %v365_v20 = vsel %vm363_vm1, %v358_v15, %v364_v18 }
 0x16a   : > { %366 = vst [vmem:[%s231_s22] sm:$0xff] %v365_v20 }
 0x16b   : > { %711 = shalt.err (!%p708_p11)
}
 0x16c   : > { %s712_s5 = scalar_lea.hbm %s1019_s26, 128  ;;  %s716_s10 = scalar_lea.hbm %s1071_s3, 256 }
 0x16d   : > { %p713_p0 = scmp.ne.s32.totalorder %s1019_s26, %s712_s5  ;;  %p717_p6 = scmp.lt.u32.totalorder %s1019_s26, %s1071_s3 }
 0x16e   : > { %p718_p7 = scmp.lt.u32.totalorder %s716_s10, %s712_s5  ;;  %p720_p8 = scmp.lt.u32.totalorder %s712_s5, %s1019_s26 }
 0x16f   : > { %p714_p4 = pnand %p713_p0, %p1086_p12 }
 0x170   : > { %p719_p2 = por %p718_p7, %p717_p6 }
 0x171   : > { %p715_p13 = pneg %p714_p4 }
 0x172   : > { %p721_p1 = por %p720_p8, %p719_p2 }
 0x174   : > { %p722_p10 = pnand %p721_p1, %p715_p13 }
 0x176   : > { %725 = shalt.err (!%p722_p10)
}
 0x177   : > { %525 = dma.vmem_to_hbm [thread:$0]  (%p1086_p12), %s1021_s24, 128, %s1019_s26, %s368_s15  }
 0x178 PF: > { %s394_s25 = sand.u32 1, %s764_s12   ;;  %p1087_p3 = scmp.ne.s32.totalorder %s1079_s23, 0 }
 0x179   : > { %p1088_p5 = scmp.ge.s32.totalorder %s784_s17, 2  ;;  %s395_s20 = scalar_lea.sflag [#allocation4], %s394_s25 }
 0x17b   : > { %p539_p9 = pnand %p1088_p5, %p1087_p3 }
 0x17d   : > { %759 = dma.done.wait (!%p539_p9), %s395_s20, 128  }
 0x17e   : > { %761 = vsyncadd (!%p539_p9), %s395_s20, 4294967168  ;;  %s20_s17 = sadd.s32 1, %s784_s17   ;;  %s1089_s12 = smov %s768_s13 }
 0x17f   : > { %p17_p11 = scmp.ge.s32.totalorder %s20_s17, 4   ;;  %s1090_s13 = smov %s772_s14 }
 0x180   : > { %s1091_s14 = smov %s956_s4  ;;  %s1092_s15 = smov %s780_s16 }
 0x181   : > { %s1093_s16 = smov %s1095_s18  ;;  %19 = sbr.rel (!%p17_p11) target bundleno = 7 (0x7), region = 85 }
 0x188   :  { %400 = vsyncpa [#allocation3], 1 }
 0x189   :  { %402 = vsyncpa [#allocation3 + $0x1], 1 }
 0x18a   :  { %403 = vsyncpa [#allocation6], 1 }
 0x18b   :  { %404 = vsyncpa [#allocation4], 1 }
 0x18c   :  { %406 = vsyncpa [#allocation4 + $0x1], 1 }

// kernel: feature_matching_loss.9
= control target key start
LH: loop header
LB: loop body
LE: loop exit
PB: predicated region body
PF: predicated region fallthrough
CT: control target
= control target key end

     0   :  { %7 = vsyncpa [#allocation3], 0  ;;  %s282_s0 = inlined_call_operand.hbm [shape: f32[2,32,128], index: 0, kind: input, shape index: {}]   ;;  %s283_s1 = inlined_call_operand.hbm [shape: f32[32,1], index: 1, kind: input, shape index: {}]   ;;  %s284_s2 = inlined_call_operand.hbm [shape: f32[1,32,128], index: 2, kind: output, shape index: {}]  }
   0x1   :  { %8 = vsyncpa [#allocation6], 0 }
   0x2   :  { %9 = vsyncpa [#allocation4], 0  ;;  %s216_s9 = smov [#allocation2]   ;;  %s144_s13 = scalar_lea.hbm %s282_s0, 1024 }
   0x3   :  { %s19_s10 = sshll.u32 %s216_s9, 4  ;;  %p145_p0 = scmp.ne.s32.totalorder %s282_s0, %s144_s13  ;;  %s20_s10 = int_to_ptr.vmem [resolvable:$true] %s19_s10 }
   0x4   :  { %p148_p1 = scmp.lt.u32.totalorder %s144_s13, %s282_s0 }
   0x6   :  { %p150_p2 = pnand %p148_p1, %p145_p0 }
   0x8   :  { %153 = shalt.err (!%p150_p2)
}
   0x9   :  { %s154_s18 = scalar_lea.vmem %s20_s10, 1024  ;;  %p159_p4 = scmp.lt.s32.totalorder %s20_s10, %s20_s10 }
   0xa   :  { %p155_p3 = scmp.ne.s32.totalorder %s20_s10, %s154_s18  ;;  %p160_p5 = scmp.lt.s32.totalorder %s154_s18, %s154_s18 }
   0xc   :  { %p161_p6 = por %p160_p5, %p159_p4 }
   0xe   :  { %p162_p7 = pnand %p161_p6, %p155_p3 }
  0x10   :  { %165 = shalt.err (!%p162_p7)
}
  0x11   :  { %s217_s19 = smov 128   ;;  %s218_s20 = smov 8  }
  0x12   :  { %25 = dma.hbm_to_vmem [thread:$0]  %s282_s0, 1024, %s20_s10, [#allocation3], %s217_s19, %s217_s19, %s218_s20  }
  0x13   :  { %s219_s23 = smov [#allocation5]   ;;  %s166_s27 = scalar_lea.hbm %s283_s1, 512 }
  0x14   :  { %s35_s24 = sshll.u32 %s219_s23, 4  ;;  %p167_p8 = scmp.ne.s32.totalorder %s283_s1, %s166_s27  ;;  %s36_s24 = int_to_ptr.vmem [resolvable:$true] %s35_s24 }
  0x15   :  { %p170_p9 = scmp.lt.u32.totalorder %s166_s27, %s283_s1 }
  0x17   :  { %p172_p10 = pnand %p170_p9, %p167_p8 }
  0x19   :  { %175 = shalt.err (!%p172_p10)
}
  0x1a   :  { %s176_s4 = scalar_lea.vmem %s36_s24, 512  ;;  %p181_p12 = scmp.lt.s32.totalorder %s36_s24, %s36_s24 }
  0x1b   :  { %p177_p11 = scmp.ne.s32.totalorder %s36_s24, %s176_s4  ;;  %p182_p13 = scmp.lt.s32.totalorder %s176_s4, %s176_s4 }
  0x1d   :  { %p183_p0 = por %p182_p13, %p181_p12 }
  0x1f   :  { %p184_p1 = pnand %p183_p0, %p177_p11 }
  0x21   :  { %187 = shalt.err (!%p184_p1)
}
  0x22   :  { %41 = dma.hbm_to_vmem [thread:$0]  %s283_s1, 512, %s36_s24, [#allocation6], %s217_s19, %s217_s19, %s218_s20  }
  0x23   :  { %210 = dma.done.wait [#allocation3], 1024  }
  0x24   :  { %211 = vsyncadd [#allocation3], 4294966272 }
  0x25   :  { %212 = dma.done.wait [#allocation6], 512  }
  0x26   :  { %213 = vsyncadd [#allocation6], 4294966784  ;;  %v220_v0 = vmov 0   ;;  %v83_v1 = vld [vmem:[#allocation5 + $0x10] sm:$0xff]  ;;  %v81_v2 = vld [vmem:[#allocation5] sm:$0xff]  ;;  %s221_s1 = smov [#allocation7]  }
  0x27   :  { %143 = vset.pattern.permute.xlu1 %v220_v0  ;;  %142 = vset.pattern.permute.xlu0 %v220_v0  ;;  %v84_v3 = vld [vmem:[#allocation5 + $0x18] sm:$0xff]  ;;  %v82_v4 = vld [vmem:[#allocation5 + $0x8] sm:$0xff]  ;;  %v62_v5 = vld [vmem:[#allocation2 + $0x10] sm:$0xff]  ;;  %s122_s6 = sshll.u32 %s221_s1, 4  ;;  %s123_s6 = int_to_ptr.vmem [resolvable:$true] %s122_s6 }
  0x28   :  { %97 = vperm.xlu1 %143, %v83_v1   ;;  %87 = vperm.xlu0 %142, %v81_v2   ;;  %v67_v6 = vld [vmem:[#allocation2 + $0x30] sm:$0xff]  ;;  %v60_v7 = vld [vmem:[#allocation2] sm:$0xff]  ;;  %v63_v11 = vld [vmem:[#allocation2 + $0x18] sm:$0xff]  ;;  %s188_s7 = scalar_lea.vmem %s123_s6, 512  ;;  %p193_p3 = scmp.lt.s32.totalorder %s123_s6, %s123_s6 }
  0x29   :  { %v65_v8 = vld [vmem:[#allocation2 + $0x20] sm:$0xff]  ;;  %v71_v9 = vsub.f32 %v62_v5, %v67_v6  ;;  %v68_v12 = vld [vmem:[#allocation2 + $0x38] sm:$0xff]  ;;  %v61_v13 = vld [vmem:[#allocation2 + $0x8] sm:$0xff]  ;;  %p189_p2 = scmp.ne.s32.totalorder %s123_s6, %s188_s7  ;;  %p194_p4 = scmp.lt.s32.totalorder %s188_s7, %s188_s7 }
  0x2a   :  { %v69_v10 = vsub.f32 %v60_v7, %v65_v8  ;;  %v66_v14 = vld [vmem:[#allocation2 + $0x28] sm:$0xff]  ;;  %v72_v17 = vsub.f32 %v63_v11, %v68_v12 }
  0x2b   :  { %v79_v15 = vmul.f32 %v71_v9, %v71_v9  ;;  %v70_v18 = vsub.f32 %v61_v13, %v66_v14  ;;  %p195_p5 = por %p194_p4, %p193_p3 }
  0x2c   :  { %102 = vperm.xlu1 %143, %v84_v3   ;;  %92 = vperm.xlu0 %142, %v82_v4   ;;  %v77_v16 = vmul.f32 %v69_v10, %v69_v10  ;;  %v80_v23 = vmul.f32 %v72_v17, %v72_v17 }
  0x2d   :  { %v78_v24 = vmul.f32 %v70_v18, %v70_v18  ;;  %p196_p6 = pnand %p195_p5, %p189_p2 }
  0xa7   :  { %v98_v19 = vpop.permute.xlu1 %97  ;;  %v88_v20 = vpop.permute.xlu0 %87 }
  0xa8   :  { %v107_v21 = vmul.f32 %v98_v19, %v79_v15  ;;  %v105_v22 = vmul.f32 %v88_v20, %v77_v16 }
  0xaa   :  { %115 = vst [vmem:[#allocation7 + $0x10] sm:$0xff] %v107_v21  ;;  %113 = vst [vmem:[#allocation7] sm:$0xff] %v105_v22 }
  0xab   :  { %v103_v25 = vpop.permute.xlu1 %102  ;;  %v93_v26 = vpop.permute.xlu0 %92 }
  0xac   :  { %v108_v27 = vmul.f32 %v103_v25, %v80_v23  ;;  %v106_v28 = vmul.f32 %v93_v26, %v78_v24 }
  0xae   :  { %116 = vst [vmem:[#allocation7 + $0x18] sm:$0xff] %v108_v27  ;;  %114 = vst [vmem:[#allocation7 + $0x8] sm:$0xff] %v106_v28 }
  0xaf   :  { %199 = shalt.err (!%p196_p6)
}
  0xb0   :  { %s200_s10 = scalar_lea.hbm %s284_s2, 512 }
  0xb1   :  { %p201_p7 = scmp.ne.s32.totalorder %s284_s2, %s200_s10  ;;  %p204_p8 = scmp.lt.u32.totalorder %s200_s10, %s284_s2 }
  0xb3   :  { %p206_p9 = pnand %p204_p8, %p201_p7 }
  0xb5   :  { %209 = shalt.err (!%p206_p9)
}
  0xb6   :  { %128 = dma.vmem_to_hbm [thread:$0]  %s123_s6, 512, %s284_s2, [#allocation4], %s217_s19, %s217_s19, %s218_s20  }
  0xb7   :  { %214 = dma.done.wait [#allocation4], 512  }
  0xb8   :  { %215 = vsyncadd [#allocation4], 4294966784 }
  0xb9   :  { %132 = vsyncpa [#allocation3], 1 }
  0xba   :  { %133 = vsyncpa [#allocation6], 1 }
  0xbb   :  { %134 = vsyncpa [#allocation4], 1 }

// kernel: feature_matching_loss.7
= control target key start
LH: loop header
LB: loop body
LE: loop exit
PB: predicated region body
PF: predicated region fallthrough
CT: control target
= control target key end

     0   :  { %7 = vsyncpa [#allocation3], 0  ;;  %s462_s0 = inlined_call_operand.hbm [shape: f32[2,128,128], index: 0, kind: input, shape index: {}]   ;;  %s463_s1 = inlined_call_operand.hbm [shape: f32[128,1], index: 1, kind: input, shape index: {}]   ;;  %s464_s2 = inlined_call_operand.hbm [shape: f32[1,128,128], index: 2, kind: output, shape index: {}]  }
   0x1   :  { %8 = vsyncpa [#allocation6], 0 }
   0x2   :  { %9 = vsyncpa [#allocation4], 0  ;;  %s396_s9 = smov [#allocation2]   ;;  %s324_s13 = scalar_lea.hbm %s462_s0, 4096 }
   0x3   :  { %s19_s10 = sshll.u32 %s396_s9, 4  ;;  %p325_p0 = scmp.ne.s32.totalorder %s462_s0, %s324_s13  ;;  %s20_s10 = int_to_ptr.vmem [resolvable:$true] %s19_s10 }
   0x4   :  { %p328_p1 = scmp.lt.u32.totalorder %s324_s13, %s462_s0 }
   0x6   :  { %p330_p2 = pnand %p328_p1, %p325_p0 }
   0x8   :  { %333 = shalt.err (!%p330_p2)
}
   0x9   :  { %s334_s18 = scalar_lea.vmem %s20_s10, 4096  ;;  %p339_p4 = scmp.lt.s32.totalorder %s20_s10, %s20_s10 }
   0xa   :  { %p335_p3 = scmp.ne.s32.totalorder %s20_s10, %s334_s18  ;;  %p340_p5 = scmp.lt.s32.totalorder %s334_s18, %s334_s18 }
   0xc   :  { %p341_p6 = por %p340_p5, %p339_p4 }
   0xe   :  { %p342_p7 = pnand %p341_p6, %p335_p3 }
  0x10   :  { %345 = shalt.err (!%p342_p7)
}
  0x11   :  { %s397_s19 = smov 128   ;;  %s398_s20 = smov 8  }
  0x12   :  { %25 = dma.hbm_to_vmem [thread:$0]  %s462_s0, 4096, %s20_s10, [#allocation3], %s397_s19, %s397_s19, %s398_s20  }
  0x13   :  { %s399_s23 = smov [#allocation5]   ;;  %s346_s27 = scalar_lea.hbm %s463_s1, 2048 }
  0x14   :  { %s35_s24 = sshll.u32 %s399_s23, 4  ;;  %p347_p8 = scmp.ne.s32.totalorder %s463_s1, %s346_s27  ;;  %s36_s24 = int_to_ptr.vmem [resolvable:$true] %s35_s24 }
  0x15   :  { %p350_p9 = scmp.lt.u32.totalorder %s346_s27, %s463_s1 }
  0x17   :  { %p352_p10 = pnand %p350_p9, %p347_p8 }
  0x19   :  { %355 = shalt.err (!%p352_p10)
}
  0x1a   :  { %s356_s4 = scalar_lea.vmem %s36_s24, 2048  ;;  %p361_p12 = scmp.lt.s32.totalorder %s36_s24, %s36_s24 }
  0x1b   :  { %p357_p11 = scmp.ne.s32.totalorder %s36_s24, %s356_s4  ;;  %p362_p13 = scmp.lt.s32.totalorder %s356_s4, %s356_s4 }
  0x1d   :  { %p363_p0 = por %p362_p13, %p361_p12 }
  0x1f   :  { %p364_p1 = pnand %p363_p0, %p357_p11 }
  0x21   :  { %367 = shalt.err (!%p364_p1)
}
  0x22   :  { %41 = dma.hbm_to_vmem [thread:$0]  %s463_s1, 2048, %s36_s24, [#allocation6], %s397_s19, %s397_s19, %s398_s20  }
  0x23   :  { %390 = dma.done.wait [#allocation3], 4096  }
  0x24   :  { %391 = vsyncadd [#allocation3], 4294963200 }
  0x25   :  { %392 = dma.done.wait [#allocation6], 2048  }
  0x26   :  { %393 = vsyncadd [#allocation6], 4294965248  ;;  %v400_v0 = vmov 0   ;;  %v155_v1 = vld [vmem:[#allocation5 + $0x10] sm:$0xff]  ;;  %v153_v2 = vld [vmem:[#allocation5] sm:$0xff]  ;;  %s401_s1 = smov [#allocation7]  }
  0x27   :  { %323 = vset.pattern.permute.xlu1 %v400_v0  ;;  %322 = vset.pattern.permute.xlu0 %v400_v0  ;;  %v156_v3 = vld [vmem:[#allocation5 + $0x18] sm:$0xff]  ;;  %v154_v4 = vld [vmem:[#allocation5 + $0x8] sm:$0xff]  ;;  %v157_v6 = vld [vmem:[#allocation5 + $0x20] sm:$0xff]  ;;  %s302_s6 = sshll.u32 %s401_s1, 4  ;;  %s303_s6 = int_to_ptr.vmem [resolvable:$true] %s302_s6 }
  0x28   :  { %181 = vperm.xlu1 %323, %v155_v1   ;;  %171 = vperm.xlu0 %322, %v153_v2   ;;  %v158_v5 = vld [vmem:[#allocation5 + $0x28] sm:$0xff]  ;;  %v160_v7 = vld [vmem:[#allocation5 + $0x38] sm:$0xff]  ;;  %v159_v8 = vld [vmem:[#allocation5 + $0x30] sm:$0xff]  ;;  %s368_s7 = scalar_lea.vmem %s303_s6, 2048  ;;  %p373_p3 = scmp.lt.s32.totalorder %s303_s6, %s303_s6 }
  0x29   :  { %v162_v9 = vld [vmem:[#allocation5 + $0x48] sm:$0xff]  ;;  %v161_v10 = vld [vmem:[#allocation5 + $0x40] sm:$0xff]  ;;  %v164_v11 = vld [vmem:[#allocation5 + $0x58] sm:$0xff]  ;;  %p369_p2 = scmp.ne.s32.totalorder %s303_s6, %s368_s7  ;;  %p374_p4 = scmp.lt.s32.totalorder %s368_s7, %s368_s7 }
  0x2a   :  { %v163_v12 = vld [vmem:[#allocation5 + $0x50] sm:$0xff]  ;;  %v166_v13 = vld [vmem:[#allocation5 + $0x68] sm:$0xff]  ;;  %v165_v14 = vld [vmem:[#allocation5 + $0x60] sm:$0xff] }
  0x2b   :  { %v168_v15 = vld [vmem:[#allocation5 + $0x78] sm:$0xff]  ;;  %v167_v16 = vld [vmem:[#allocation5 + $0x70] sm:$0xff]  ;;  %v72_v19 = vld [vmem:[#allocation2] sm:$0xff]  ;;  %p375_p5 = por %p374_p4, %p373_p3 }
  0x2c   :  { %186 = vperm.xlu1 %323, %v156_v3   ;;  %176 = vperm.xlu0 %322, %v154_v4   ;;  %v74_v17 = vld [vmem:[#allocation2 + $0x10] sm:$0xff]  ;;  %v89_v20 = vld [vmem:[#allocation2 + $0x80] sm:$0xff]  ;;  %v75_v23 = vld [vmem:[#allocation2 + $0x18] sm:$0xff] }
  0x2d   :  { %v91_v18 = vld [vmem:[#allocation2 + $0x90] sm:$0xff]  ;;  %v105_v22 = vsub.f32 %v72_v19, %v89_v20  ;;  %v92_v24 = vld [vmem:[#allocation2 + $0x98] sm:$0xff]  ;;  %v73_v25 = vld [vmem:[#allocation2 + $0x8] sm:$0xff]  ;;  %p376_p6 = pnand %p375_p5, %p369_p2 }
  0x2e   :  { %v107_v21 = vsub.f32 %v74_v17, %v91_v18  ;;  %v90_v26 = vld [vmem:[#allocation2 + $0x88] sm:$0xff]  ;;  %v108_v27 = vsub.f32 %v75_v23, %v92_v24  ;;  %v76_v33 = vld [vmem:[#allocation2 + $0x20] sm:$0xff]  ;;  %v79_v43 = vld [vmem:[#allocation2 + $0x38] sm:$0xff] }
  0x2f   :  { %v137_v29 = vmul.f32 %v105_v22, %v105_v22  ;;  %v106_v30 = vsub.f32 %v73_v25, %v90_v26  ;;  %v77_v31 = vld [vmem:[#allocation2 + $0x28] sm:$0xff]  ;;  %v93_v34 = vld [vmem:[#allocation2 + $0xa0] sm:$0xff]  ;;  %v96_v44 = vld [vmem:[#allocation2 + $0xb8] sm:$0xff] }
  0x30   :  { %196 = vperm.xlu1 %323, %v158_v5   ;;  %191 = vperm.xlu0 %322, %v157_v6   ;;  %v139_v28 = vmul.f32 %v107_v21, %v107_v21  ;;  %v94_v32 = vld [vmem:[#allocation2 + $0xa8] sm:$0xff]  ;;  %v140_v37 = vmul.f32 %v108_v27, %v108_v27  ;;  %v109_v42 = vsub.f32 %v76_v33, %v93_v34  ;;  %v78_v45 = vld [vmem:[#allocation2 + $0x30] sm:$0xff]  ;;  %v80_v57 = vld [vmem:[#allocation2 + $0x40] sm:$0xff] }
  0x31   :  { %v110_v38 = vsub.f32 %v77_v31, %v94_v32  ;;  %v138_v41 = vmul.f32 %v106_v30, %v106_v30  ;;  %v95_v46 = vld [vmem:[#allocation2 + $0xb0] sm:$0xff]  ;;  %v112_v50 = vsub.f32 %v79_v43, %v96_v44  ;;  %v81_v51 = vld [vmem:[#allocation2 + $0x48] sm:$0xff]  ;;  %v97_v58 = vld [vmem:[#allocation2 + $0xc0] sm:$0xff] }
  0x32   :  { %v141_v54 = vmul.f32 %v109_v42, %v109_v42  ;;  %v111_v55 = vsub.f32 %v78_v45, %v95_v46  ;;  %v98_v56 = vld [vmem:[#allocation2 + $0xc8] sm:$0xff]  ;;  %v113_v62 = vsub.f32 %v80_v57, %v97_v58  ;;  %v83_v3 = vld [vmem:[#allocation2 + $0x58] sm:$0xff]  ;;  %v82_v5 = vld [vmem:[#allocation2 + $0x50] sm:$0xff] }
  0x33   :  { %v142_v49 = vmul.f32 %v110_v38, %v110_v38  ;;  %v114_v61 = vsub.f32 %v81_v51, %v98_v56  ;;  %v144_v1 = vmul.f32 %v112_v50, %v112_v50  ;;  %v100_v4 = vld [vmem:[#allocation2 + $0xd8] sm:$0xff]  ;;  %v99_v6 = vld [vmem:[#allocation2 + $0xd0] sm:$0xff]  ;;  %v84_v17 = vld [vmem:[#allocation2 + $0x60] sm:$0xff] }
  0x34   :  { %206 = vperm.xlu1 %323, %v160_v7   ;;  %201 = vperm.xlu0 %322, %v159_v8   ;;  %v143_v2 = vmul.f32 %v111_v55, %v111_v55  ;;  %v101_v18 = vld [vmem:[#allocation2 + $0xe0] sm:$0xff]  ;;  %v87_v27 = vld [vmem:[#allocation2 + $0x78] sm:$0xff]  ;;  %v103_v30 = vld [vmem:[#allocation2 + $0xf0] sm:$0xff] }
  0x35   :  { %v117_v22 = vsub.f32 %v84_v17, %v101_v18 }
  0x37   :  { %v149_v34 = vmul.f32 %v117_v22, %v117_v22 }
  0x38   :  { %216 = vperm.xlu1 %323, %v162_v9   ;;  %211 = vperm.xlu0 %322, %v161_v10   ;;  %v146_v9 = vmul.f32 %v114_v61, %v114_v61  ;;  %v145_v10 = vmul.f32 %v113_v62, %v113_v62 }
  0x3c   :  { %226 = vperm.xlu1 %323, %v164_v11   ;;  %221 = vperm.xlu0 %322, %v163_v12   ;;  %v85_v11 = vld [vmem:[#allocation2 + $0x68] sm:$0xff] }
  0x40   :  { %236 = vperm.xlu1 %323, %v166_v13   ;;  %231 = vperm.xlu0 %322, %v165_v14   ;;  %v116_v14 = vsub.f32 %v83_v3, %v100_v4 }
  0x42   :  { %v148_v25 = vmul.f32 %v116_v14, %v116_v14 }
  0x44   :  { %246 = vperm.xlu1 %323, %v168_v15   ;;  %241 = vperm.xlu0 %322, %v167_v16   ;;  %v115_v15 = vsub.f32 %v82_v5, %v99_v6  ;;  %v102_v16 = vld [vmem:[#allocation2 + $0xe8] sm:$0xff] }
  0x45   :  { %v118_v21 = vsub.f32 %v85_v11, %v102_v16 }
  0x46   :  { %v147_v26 = vmul.f32 %v115_v15, %v115_v15 }
  0x47   :  { %v150_v33 = vmul.f32 %v118_v21, %v118_v21 }
  0xa7   :  { %v182_v35 = vpop.permute.xlu1 %181  ;;  %v172_v36 = vpop.permute.xlu0 %171 }
  0xa8   :  { %v251_v39 = vmul.f32 %v182_v35, %v139_v28  ;;  %v249_v40 = vmul.f32 %v172_v36, %v137_v29  ;;  %v104_v28 = vld [vmem:[#allocation2 + $0xf8] sm:$0xff]  ;;  %v86_v29 = vld [vmem:[#allocation2 + $0x70] sm:$0xff] }
  0xa9   :  { %v119_v38 = vsub.f32 %v86_v29, %v103_v30 }
  0xaa   :  { %283 = vst [vmem:[#allocation7 + $0x10] sm:$0xff] %v251_v39  ;;  %281 = vst [vmem:[#allocation7] sm:$0xff] %v249_v40 }
  0xab   :  { %v187_v47 = vpop.permute.xlu1 %186  ;;  %v177_v48 = vpop.permute.xlu0 %176  ;;  %v151_v44 = vmul.f32 %v119_v38, %v119_v38 }
  0xac   :  { %v252_v52 = vmul.f32 %v187_v47, %v140_v37  ;;  %v250_v53 = vmul.f32 %v177_v48, %v138_v41  ;;  %v120_v37 = vsub.f32 %v87_v27, %v104_v28 }
  0xae   :  { %284 = vst [vmem:[#allocation7 + $0x18] sm:$0xff] %v252_v52  ;;  %282 = vst [vmem:[#allocation7 + $0x8] sm:$0xff] %v250_v53  ;;  %v152_v43 = vmul.f32 %v120_v37, %v120_v37 }
  0xaf   :  { %v197_v59 = vpop.permute.xlu1 %196  ;;  %v192_v60 = vpop.permute.xlu0 %191 }
  0xb0   :  { %v254_v63 = vmul.f32 %v197_v59, %v142_v49  ;;  %v253_v0 = vmul.f32 %v192_v60, %v141_v54 }
  0xb2   :  { %286 = vst [vmem:[#allocation7 + $0x28] sm:$0xff] %v254_v63  ;;  %285 = vst [vmem:[#allocation7 + $0x20] sm:$0xff] %v253_v0 }
  0xb3   :  { %v207_v7 = vpop.permute.xlu1 %206  ;;  %v202_v8 = vpop.permute.xlu0 %201 }
  0xb4   :  { %v256_v12 = vmul.f32 %v207_v7, %v144_v1  ;;  %v255_v13 = vmul.f32 %v202_v8, %v143_v2 }
  0xb6   :  { %288 = vst [vmem:[#allocation7 + $0x38] sm:$0xff] %v256_v12  ;;  %287 = vst [vmem:[#allocation7 + $0x30] sm:$0xff] %v255_v13 }
  0xb7   :  { %v217_v19 = vpop.permute.xlu1 %216  ;;  %v212_v20 = vpop.permute.xlu0 %211 }
  0xb8   :  { %v258_v23 = vmul.f32 %v217_v19, %v146_v9  ;;  %v257_v24 = vmul.f32 %v212_v20, %v145_v10 }
  0xba   :  { %290 = vst [vmem:[#allocation7 + $0x48] sm:$0xff] %v258_v23  ;;  %289 = vst [vmem:[#allocation7 + $0x40] sm:$0xff] %v257_v24 }
  0xbb   :  { %v227_v31 = vpop.permute.xlu1 %226  ;;  %v222_v32 = vpop.permute.xlu0 %221 }
  0xbc   :  { %v260_v35 = vmul.f32 %v227_v31, %v148_v25  ;;  %v259_v36 = vmul.f32 %v222_v32, %v147_v26 }
  0xbe   :  { %292 = vst [vmem:[#allocation7 + $0x58] sm:$0xff] %v260_v35  ;;  %291 = vst [vmem:[#allocation7 + $0x50] sm:$0xff] %v259_v36 }
  0xbf   :  { %v237_v39 = vpop.permute.xlu1 %236  ;;  %v232_v40 = vpop.permute.xlu0 %231 }
  0xc0   :  { %v262_v41 = vmul.f32 %v237_v39, %v150_v33  ;;  %v261_v42 = vmul.f32 %v232_v40, %v149_v34 }
  0xc2   :  { %294 = vst [vmem:[#allocation7 + $0x68] sm:$0xff] %v262_v41  ;;  %293 = vst [vmem:[#allocation7 + $0x60] sm:$0xff] %v261_v42 }
  0xc3   :  { %v247_v45 = vpop.permute.xlu1 %246  ;;  %v242_v46 = vpop.permute.xlu0 %241 }
  0xc4   :  { %v264_v47 = vmul.f32 %v247_v45, %v152_v43  ;;  %v263_v48 = vmul.f32 %v242_v46, %v151_v44 }
  0xc6   :  { %296 = vst [vmem:[#allocation7 + $0x78] sm:$0xff] %v264_v47  ;;  %295 = vst [vmem:[#allocation7 + $0x70] sm:$0xff] %v263_v48 }
  0xc7   :  { %379 = shalt.err (!%p376_p6)
}
  0xc8   :  { %s380_s10 = scalar_lea.hbm %s464_s2, 2048 }
  0xc9   :  { %p381_p7 = scmp.ne.s32.totalorder %s464_s2, %s380_s10  ;;  %p384_p8 = scmp.lt.u32.totalorder %s380_s10, %s464_s2 }
  0xcb   :  { %p386_p9 = pnand %p384_p8, %p381_p7 }
  0xcd   :  { %389 = shalt.err (!%p386_p9)
}
  0xce   :  { %308 = dma.vmem_to_hbm [thread:$0]  %s303_s6, 2048, %s464_s2, [#allocation4], %s397_s19, %s397_s19, %s398_s20  }
  0xcf   :  { %394 = dma.done.wait [#allocation4], 2048  }
  0xd0   :  { %395 = vsyncadd [#allocation4], 4294965248 }
  0xd1   :  { %312 = vsyncpa [#allocation3], 1 }
  0xd2   :  { %313 = vsyncpa [#allocation6], 1 }
  0xd3   :  { %314 = vsyncpa [#allocation4], 1 }

</bundles_post_ra>
